<compile_context>
chip_gen: v7x
topology: tpu7x:2x2x1
jax: 0.10.0
libtpu: 0.0.40
codegen_flags: <defaults>
</compile_context>

<pallas_src>
import functools

import jax
import jax.numpy as jnp
from jax.experimental import pallas as pl
from jax.experimental.pallas import tpu as pltpu

_SUBLANE = 8     # Cin / row-pitch padding granularity


def _round_up(x, m):
    return (x + m - 1) // m * m


def _reparam_conv_kernel(x_ref, w_ref, b_ref, o_ref, acc_ref, *col_scratch,
                         Wp, Q, C_pad, use_im2col):
    """One grid step = one (n, d, cout-tile) output block x one depth tap dt.

    x_ref  : (R, C_pad)          bf16  guard-padded channels-last plane at depth d+dt
    w_ref  : (3, 9*C_pad, CO_T)  bf16  combined (main + lambda*aux) weight, Cout tile
    b_ref  : (1, CO_T)           f32   combined bias, Cout tile
    o_ref  : (Q, CO_T)           bf16  output block (written once, at dt==2)
    acc_ref: (Q, CO_T)           f32   VMEM accumulator, resident across dt
    col_scratch (im2col path only): (Q, 9*C_pad) bf16 in-VMEM im2col buffer
    """
    dt = pl.program_id(3)

    if use_im2col:
        col_ref = col_scratch[0]
        # Pack the 9 row-shifted tap slices into the contraction dim (VPU copies),
        # then ONE MXU matmul per grid step with K = 9*C_pad.
        for dh in range(3):
            for dw in range(3):
                t = dh * 3 + dw
                # static offset; dh offsets are sublane-aligned because Wp % 8 == 0
                start = (dh + 1) * Wp + dw - 1
                col_ref[:, t * C_pad:(t + 1) * C_pad] = x_ref[start:start + Q, :]
        acc = jnp.dot(col_ref[...], w_ref[dt], preferred_element_type=jnp.float32)
    else:
        # Cin >= 128: K already fills the MXU depth; keep per-tap matmuls.
        # TODO(synk): row-tile Q here to bound the live f32 partial chain.
        acc = None
        for dh in range(3):
            for dw in range(3):
                t = dh * 3 + dw
                start = (dh + 1) * Wp + dw - 1
                part = jnp.dot(x_ref[start:start + Q, :],
                               w_ref[dt, t * C_pad:(t + 1) * C_pad, :],
                               preferred_element_type=jnp.float32)
                acc = part if acc is None else acc + part

    # Bias folded into the first depth tap (no separate broadcast-init pass).
    @pl.when(dt == 0)
    def _():
        acc_ref[...] = acc + b_ref[...]

    @pl.when(dt > 0)
    def _():
        acc_ref[...] += acc

    # Last depth tap: cast once and write the bf16 output block.
    @pl.when(dt == 2)
    def _():
        o_ref[...] = acc_ref[...].astype(o_ref.dtype)


def reparameterized_conv3d(x, main_w, aux_w, main_b, aux_b, lam):
    """Forward of ReparameterizedConv: conv3d(x, main_w + lam*aux_w,
    main_b + lam*aux_b, stride=1, padding=1).  x is NCDHW, weights OIDHW."""
    N, Cin, D, H, W = x.shape
    Cout = main_w.shape[0]
    assert main_w.shape == (Cout, Cin, 3, 3, 3), "stride=1/padding=1 path expects 3x3x3"

    C_pad = _round_up(Cin, _SUBLANE)
    use_im2col = C_pad < 128                 # fold taps into K only when Cin is small
    CO_T = 128 if Cout <= 128 else 256       # 256-wide Cout tiles for v6e/v7x MXU width
    Co_p = _round_up(Cout, CO_T)
    n_co = Co_p // CO_T

    Dp, Hp = D + 2, H + 2
    Wp = _round_up(W + 2, _SUBLANE)          # row pitch padded to a sublane multiple
    R = (H + 6) * Wp                         # conv pad (1) + guard (2) rows per H side
    Q = Hp * Wp                              # outputs per plane (incl. junk ring), %8==0
    K9 = 9 * C_pad

    # ---- reparameterization hoisted out of the kernel (tiny op), done in f32 ----
    comb_w = main_w.astype(jnp.float32) + lam * aux_w.astype(jnp.float32)
    if main_b is not None:
        comb_b = main_b.astype(jnp.float32) + lam * aux_b.astype(jnp.float32)
    else:
        comb_b = jnp.zeros((Cout,), jnp.float32)

    # OIDHW -> (kT,kH,kW,Cin,Cout), pad channels, fold (kH,kW,Cin) into K, bf16.
    w_t = jnp.transpose(comb_w, (2, 3, 4, 1, 0))
    w_t = jnp.pad(w_t, ((0, 0), (0, 0), (0, 0), (0, C_pad - Cin), (0, Co_p - Cout)))
    w_t = w_t.reshape(3, K9, Co_p).astype(jnp.bfloat16)
    b_t = jnp.pad(comb_b, (0, Co_p - Cout)).reshape(1, Co_p)

    # NCDHW -> NDHWC (channels on lanes), bf16; pad D by 1, H by 3 (1 conv + 2 guard),
    # W left by 1 / right up to the padded pitch, channels to C_pad; flatten planes.
    x_cl = jnp.transpose(x, (0, 2, 3, 4, 1)).astype(jnp.bfloat16)
    x_cl = jnp.pad(x_cl, ((0, 0), (1, 1), (3, 3), (1, Wp - (W + 1)), (0, C_pad - Cin)))
    x_planes = x_cl.reshape(N, Dp, R, C_pad)

    kernel = functools.partial(_reparam_conv_kernel, Wp=Wp, Q=Q, C_pad=C_pad,
                               use_im2col=use_im2col)

    scratch = [pltpu.VMEM((Q, CO_T), jnp.float32)]
    if use_im2col:
        scratch.append(pltpu.VMEM((Q, K9), jnp.bfloat16))

    # Shape-dependent VMEM budget (pipeline double-buffers the HBM-tiled blocks).
    est = (2 * R * C_pad * 2            # input plane (bf16), double-buffered
           + 2 * 3 * K9 * CO_T * 2      # weight tile (bf16)
           + 2 * CO_T * 4               # bias tile (f32)
           + 2 * Q * CO_T * 2           # output block (bf16)
           + Q * CO_T * 4               # f32 accumulator scratch
           + (Q * K9 * 2 if use_im2col else 0))
    vmem_limit = int(min(max(2 * est, 32 * 2 ** 20), 96 * 2 ** 20))

    out = pl.pallas_call(
        kernel,
        out_shape=jax.ShapeDtypeStruct((N, D, Q, Co_p), jnp.bfloat16),
        grid=(N, D, n_co, 3),
        in_specs=[
            # Padded input plane at depth d + dt (re-read 3x, never 27x).
            pl.BlockSpec((None, None, R, C_pad),
                         lambda n, d, co, dt: (n, d + dt, 0, 0)),
            # Combined weight, one Cout band; constant across dt -> resident per band.
            pl.BlockSpec((3, K9, CO_T), lambda n, d, co, dt: (0, 0, co)),
            # Combined bias band.
            pl.BlockSpec((1, CO_T), lambda n, d, co, dt: (0, co)),
        ],
        # Output block constant across dt => written once at dt==2, flushed on change.
        out_specs=pl.BlockSpec((None, None, Q, CO_T),
                               lambda n, d, co, dt: (n, d, 0, co)),
        scratch_shapes=scratch,
        compiler_params=pltpu.CompilerParams(
            dimension_semantics=("parallel", "parallel", "parallel", "arbitrary"),
            vmem_limit_bytes=vmem_limit,
        ),
    )(x_planes, w_t, b_t)

    # (N, D, Q, Co_p) -> drop junk border ring + padded channels -> NCDHW, x.dtype.
    out = out.reshape(N, D, Hp, Wp, Co_p)[:, :, 1:H + 1, 1:W + 1, :Cout]
    out = jnp.transpose(out, (0, 4, 1, 2, 3))
    return out.astype(x.dtype)


if __name__ == "__main__":
    N, Cin, Cout = 2, 4, 8
    D, H, W = 4, 8, 8
    key = jax.random.PRNGKey(0)
    k_x, k_mw, k_aw, k_mb, k_ab = jax.random.split(key, 5)

    x = jax.random.normal(k_x, (N, Cin, D, H, W), dtype=jnp.float32)
    main_w = jax.random.normal(k_mw, (Cout, Cin, 3, 3, 3), dtype=jnp.float32) * 0.1
    aux_w = jax.random.normal(k_aw, (Cout, Cin, 3, 3, 3), dtype=jnp.float32) * 0.1
    main_b = jax.random.normal(k_mb, (Cout,), dtype=jnp.float32) * 0.1
    aux_b = jax.random.normal(k_ab, (Cout,), dtype=jnp.float32) * 0.1
    # Module __init__ sets lambda_ = 0.0; use a nonzero value so the reparam path is exercised.
    lam = jnp.float32(0.3)

    out = jax.jit(reparameterized_conv3d)(x, main_w, aux_w, main_b, aux_b, lam)
    out = jax.block_until_ready(out)

    # Pure-JAX f32 reference; kernel feeds the MXU bf16 operands with f32 accumulation
    # and writes bf16 back, so tolerances are bf16-level.
    comb_w = main_w + lam * aux_w
    comb_b = main_b + lam * aux_b
    ref = jax.lax.conv_general_dilated(
        x, comb_w, window_strides=(1, 1, 1),
        padding=((1, 1), (1, 1), (1, 1)),
        dimension_numbers=("NCDHW", "OIDHW", "NCDHW"))
    ref = ref + comb_b.reshape(1, Cout, 1, 1, 1)

    assert out.shape == (N, Cout, D, H, W), out.shape
    max_err = float(jnp.max(jnp.abs(out - ref)))
    assert jnp.allclose(out, ref, rtol=5e-2, atol=5e-2), max_err
    print("KERNEL_OK")
</pallas_src>

<mosaic_0001>
module attributes {stable_mosaic.version = 11 : i64} {
  func.func @_reparam_conv_kernel(%arg0: i32, %arg1: i32, %arg2: i32, %arg3: i32, %arg4: memref<1x1x224x8xbf16, #tpu.memory_space<vmem>>, %arg5: memref<3x72x128xbf16, #tpu.memory_space<vmem>>, %arg6: memref<1x128xf32, #tpu.memory_space<vmem>>, %arg7: memref<1x1x160x128xbf16, #tpu.memory_space<vmem>>, %arg8: memref<160x128xf32, #tpu.memory_space<vmem>>, %arg9: memref<160x72xbf16, #tpu.memory_space<vmem>>) attributes {dimension_semantics = [#tpu.dimension_semantics<parallel>, #tpu.dimension_semantics<parallel>, #tpu.dimension_semantics<parallel>, #tpu.dimension_semantics<arbitrary>], iteration_bounds = array<i64: 2, 4, 1, 3>, scalar_prefetch = 0 : i64, scratch_operands = 2 : i64, tpu.core_type = #tpu.core_type<tc>, window_params = [{transform_indices = @transform_0, window_bounds = array<i64: 1, 1, 224, 8>}, {transform_indices = @transform_1, window_bounds = array<i64: 3, 72, 128>}, {transform_indices = @transform_2, window_bounds = array<i64: 1, 128>}, {transform_indices = @transform_3, window_bounds = array<i64: 1, 1, 160, 128>}]} {
    %c0 = arith.constant 0 : index
    %c0_0 = arith.constant 0 : index
    %c15 = arith.constant 15 : index
    %c0_1 = arith.constant 0 : index
    %0 = vector.load %arg4[%c0, %c0_0, %c15, %c0_1] : memref<1x1x224x8xbf16, #tpu.memory_space<vmem>>, vector<1x1x160x8xbf16>
    %1 = vector.shape_cast %0 : vector<1x1x160x8xbf16> to vector<160x8xbf16>
    %c0_2 = arith.constant 0 : index
    %c0_3 = arith.constant 0 : index
    %2 = vector.load %arg9[%c0_2, %c0_3] : memref<160x72xbf16, #tpu.memory_space<vmem>>, vector<160x8xbf16>
    tpu.vector_store %arg9[%c0_2, %c0_3], %1 {strides = array<i32>} : memref<160x72xbf16, #tpu.memory_space<vmem>>, vector<160x8xbf16>,
    %c0_4 = arith.constant 0 : index
    %c0_5 = arith.constant 0 : index
    %c16 = arith.constant 16 : index
    %c0_6 = arith.constant 0 : index
    %3 = vector.load %arg4[%c0_4, %c0_5, %c16, %c0_6] : memref<1x1x224x8xbf16, #tpu.memory_space<vmem>>, vector<1x1x160x8xbf16>
    %4 = vector.shape_cast %3 : vector<1x1x160x8xbf16> to vector<160x8xbf16>
    %c0_7 = arith.constant 0 : index
    %c8 = arith.constant 8 : index
    %5 = vector.load %arg9[%c0_7, %c8] : memref<160x72xbf16, #tpu.memory_space<vmem>>, vector<160x8xbf16>
    tpu.vector_store %arg9[%c0_7, %c8], %4 {strides = array<i32>} : memref<160x72xbf16, #tpu.memory_space<vmem>>, vector<160x8xbf16>,
    %c0_8 = arith.constant 0 : index
    %c0_9 = arith.constant 0 : index
    %c17 = arith.constant 17 : index
    %c0_10 = arith.constant 0 : index
    %6 = vector.load %arg4[%c0_8, %c0_9, %c17, %c0_10] : memref<1x1x224x8xbf16, #tpu.memory_space<vmem>>, vector<1x1x160x8xbf16>
    %7 = vector.shape_cast %6 : vector<1x1x160x8xbf16> to vector<160x8xbf16>
    %c0_11 = arith.constant 0 : index
    %c16_12 = arith.constant 16 : index
    %8 = vector.load %arg9[%c0_11, %c16_12] : memref<160x72xbf16, #tpu.memory_space<vmem>>, vector<160x8xbf16>
    tpu.vector_store %arg9[%c0_11, %c16_12], %7 {strides = array<i32>} : memref<160x72xbf16, #tpu.memory_space<vmem>>, vector<160x8xbf16>,
    %c0_13 = arith.constant 0 : index
    %c0_14 = arith.constant 0 : index
    %c31 = arith.constant 31 : index
    %c0_15 = arith.constant 0 : index
    %9 = vector.load %arg4[%c0_13, %c0_14, %c31, %c0_15] : memref<1x1x224x8xbf16, #tpu.memory_space<vmem>>, vector<1x1x160x8xbf16>
    %10 = vector.shape_cast %9 : vector<1x1x160x8xbf16> to vector<160x8xbf16>
    %c0_16 = arith.constant 0 : index
    %c24 = arith.constant 24 : index
    %11 = vector.load %arg9[%c0_16, %c24] : memref<160x72xbf16, #tpu.memory_space<vmem>>, vector<160x8xbf16>
    tpu.vector_store %arg9[%c0_16, %c24], %10 {strides = array<i32>} : memref<160x72xbf16, #tpu.memory_space<vmem>>, vector<160x8xbf16>,
    %c0_17 = arith.constant 0 : index
    %c0_18 = arith.constant 0 : index
    %c32 = arith.constant 32 : index
    %c0_19 = arith.constant 0 : index
    %12 = vector.load %arg4[%c0_17, %c0_18, %c32, %c0_19] : memref<1x1x224x8xbf16, #tpu.memory_space<vmem>>, vector<1x1x160x8xbf16>
    %13 = vector.shape_cast %12 : vector<1x1x160x8xbf16> to vector<160x8xbf16>
    %c0_20 = arith.constant 0 : index
    %c32_21 = arith.constant 32 : index
    %14 = vector.load %arg9[%c0_20, %c32_21] : memref<160x72xbf16, #tpu.memory_space<vmem>>, vector<160x8xbf16>
    tpu.vector_store %arg9[%c0_20, %c32_21], %13 {strides = array<i32>} : memref<160x72xbf16, #tpu.memory_space<vmem>>, vector<160x8xbf16>,
    %c0_22 = arith.constant 0 : index
    %c0_23 = arith.constant 0 : index
    %c33 = arith.constant 33 : index
    %c0_24 = arith.constant 0 : index
    %15 = vector.load %arg4[%c0_22, %c0_23, %c33, %c0_24] : memref<1x1x224x8xbf16, #tpu.memory_space<vmem>>, vector<1x1x160x8xbf16>
    %16 = vector.shape_cast %15 : vector<1x1x160x8xbf16> to vector<160x8xbf16>
    %c0_25 = arith.constant 0 : index
    %c40 = arith.constant 40 : index
    %17 = vector.load %arg9[%c0_25, %c40] : memref<160x72xbf16, #tpu.memory_space<vmem>>, vector<160x8xbf16>
    tpu.vector_store %arg9[%c0_25, %c40], %16 {strides = array<i32>} : memref<160x72xbf16, #tpu.memory_space<vmem>>, vector<160x8xbf16>,
    %c0_26 = arith.constant 0 : index
    %c0_27 = arith.constant 0 : index
    %c47 = arith.constant 47 : index
    %c0_28 = arith.constant 0 : index
    %18 = vector.load %arg4[%c0_26, %c0_27, %c47, %c0_28] : memref<1x1x224x8xbf16, #tpu.memory_space<vmem>>, vector<1x1x160x8xbf16>
    %19 = vector.shape_cast %18 : vector<1x1x160x8xbf16> to vector<160x8xbf16>
    %c0_29 = arith.constant 0 : index
    %c48 = arith.constant 48 : index
    %20 = vector.load %arg9[%c0_29, %c48] : memref<160x72xbf16, #tpu.memory_space<vmem>>, vector<160x8xbf16>
    tpu.vector_store %arg9[%c0_29, %c48], %19 {strides = array<i32>} : memref<160x72xbf16, #tpu.memory_space<vmem>>, vector<160x8xbf16>,
    %c0_30 = arith.constant 0 : index
    %c0_31 = arith.constant 0 : index
    %c48_32 = arith.constant 48 : index
    %c0_33 = arith.constant 0 : index
    %21 = vector.load %arg4[%c0_30, %c0_31, %c48_32, %c0_33] : memref<1x1x224x8xbf16, #tpu.memory_space<vmem>>, vector<1x1x160x8xbf16>
    %22 = vector.shape_cast %21 : vector<1x1x160x8xbf16> to vector<160x8xbf16>
    %c0_34 = arith.constant 0 : index
    %c56 = arith.constant 56 : index
    %23 = vector.load %arg9[%c0_34, %c56] : memref<160x72xbf16, #tpu.memory_space<vmem>>, vector<160x8xbf16>
    tpu.vector_store %arg9[%c0_34, %c56], %22 {strides = array<i32>} : memref<160x72xbf16, #tpu.memory_space<vmem>>, vector<160x8xbf16>,
    %c0_35 = arith.constant 0 : index
    %c0_36 = arith.constant 0 : index
    %c49 = arith.constant 49 : index
    %c0_37 = arith.constant 0 : index
    %24 = vector.load %arg4[%c0_35, %c0_36, %c49, %c0_37] : memref<1x1x224x8xbf16, #tpu.memory_space<vmem>>, vector<1x1x160x8xbf16>
    %25 = vector.shape_cast %24 : vector<1x1x160x8xbf16> to vector<160x8xbf16>
    %c0_38 = arith.constant 0 : index
    %c64 = arith.constant 64 : index
    %26 = vector.load %arg9[%c0_38, %c64] : memref<160x72xbf16, #tpu.memory_space<vmem>>, vector<160x8xbf16>
    tpu.vector_store %arg9[%c0_38, %c64], %25 {strides = array<i32>} : memref<160x72xbf16, #tpu.memory_space<vmem>>, vector<160x8xbf16>,
    %c0_39 = arith.constant 0 : index
    %c0_40 = arith.constant 0 : index
    %27 = vector.load %arg9[%c0_39, %c0_40] : memref<160x72xbf16, #tpu.memory_space<vmem>>, vector<160x72xbf16>
    %28 = arith.index_cast %arg3 : i32 to index
    %c0_41 = arith.constant 0 : index
    %c0_42 = arith.constant 0 : index
    %29 = vector.load %arg5[%28, %c0_41, %c0_42] : memref<3x72x128xbf16, #tpu.memory_space<vmem>>, vector<1x72x128xbf16>
    %30 = vector.shape_cast %29 : vector<1x72x128xbf16> to vector<72x128xbf16>
    %cst = arith.constant dense<0.000000e+00> : vector<160x128xf32>
    %31 = tpu.matmul %27, %30, %cst {dimension_numbers = #tpu.dot_dimension_numbers<[1], [0], [0], [1], [0, 0, 1, 1], [], []>} : vector<160x72xbf16>, vector<72x128xbf16>, vector<160x128xf32> -> vector<160x128xf32>
    %c0_i32 = arith.constant 0 : i32
    %32 = arith.cmpi eq, %arg3, %c0_i32 : i32
    %33 = arith.extui %32 : i1 to i32
    %c0_i32_43 = arith.constant 0 : i32
    %34 = arith.cmpi ne, %33, %c0_i32_43 : i32
    scf.if %34 {
      %c0_47 = arith.constant 0 : index
      %c0_48 = arith.constant 0 : index
      %41 = vector.load %arg6[%c0_47, %c0_48] : memref<1x128xf32, #tpu.memory_space<vmem>>, vector<1x128xf32>
      %42 = vector.broadcast %41 : vector<1x128xf32> to vector<160x128xf32>
      %43 = arith.addf %31, %42 : vector<160x128xf32>
      %c0_49 = arith.constant 0 : index
      %c0_50 = arith.constant 0 : index
      %44 = vector.load %arg8[%c0_49, %c0_50] : memref<160x128xf32, #tpu.memory_space<vmem>>, vector<160x128xf32>
      tpu.vector_store %arg8[%c0_49, %c0_50], %43 {strides = array<i32>} : memref<160x128xf32, #tpu.memory_space<vmem>>, vector<160x128xf32>,
    } else {
    }
    %c0_i32_44 = arith.constant 0 : i32
    %35 = arith.cmpi sgt, %arg3, %c0_i32_44 : i32
    %36 = arith.extui %35 : i1 to i32
    %c0_i32_45 = arith.constant 0 : i32
    %37 = arith.cmpi ne, %36, %c0_i32_45 : i32
    scf.if %37 {
      %c0_47 = arith.constant 0 : index
      %c0_48 = arith.constant 0 : index
      %41 = vector.load %arg8[%c0_47, %c0_48] : memref<160x128xf32, #tpu.memory_space<vmem>>, vector<160x128xf32>
      %42 = arith.addf %41, %31 : vector<160x128xf32>
      %c0_49 = arith.constant 0 : index
      %c0_50 = arith.constant 0 : index
      %43 = vector.load %arg8[%c0_49, %c0_50] : memref<160x128xf32, #tpu.memory_space<vmem>>, vector<160x128xf32>
      tpu.vector_store %arg8[%c0_49, %c0_50], %42 {strides = array<i32>} : memref<160x128xf32, #tpu.memory_space<vmem>>, vector<160x128xf32>,
    } else {
    }
    %c2_i32 = arith.constant 2 : i32
    %38 = arith.cmpi eq, %arg3, %c2_i32 : i32
    %39 = arith.extui %38 : i1 to i32
    %c0_i32_46 = arith.constant 0 : i32
    %40 = arith.cmpi ne, %39, %c0_i32_46 : i32
    scf.if %40 {
      %c0_47 = arith.constant 0 : index
      %c0_48 = arith.constant 0 : index
      %41 = vector.load %arg8[%c0_47, %c0_48] : memref<160x128xf32, #tpu.memory_space<vmem>>, vector<160x128xf32>
      %42 = arith.truncf %41 : vector<160x128xf32> to vector<160x128xbf16>
      %c0_49 = arith.constant 0 : index
      %c0_50 = arith.constant 0 : index
      %c0_51 = arith.constant 0 : index
      %c0_52 = arith.constant 0 : index
      %43 = vector.load %arg7[%c0_49, %c0_50, %c0_51, %c0_52] : memref<1x1x160x128xbf16, #tpu.memory_space<vmem>>, vector<1x1x160x128xbf16>
      %44 = vector.shape_cast %43 : vector<1x1x160x128xbf16> to vector<160x128xbf16>
      %45 = vector.shape_cast %42 : vector<160x128xbf16> to vector<1x1x160x128xbf16>
      tpu.vector_store %arg7[%c0_49, %c0_50, %c0_51, %c0_52], %45 {strides = array<i32>} : memref<1x1x160x128xbf16, #tpu.memory_space<vmem>>, vector<1x1x160x128xbf16>,
    } else {
    }
    return
  }
  func.func @transform_0(%arg0: i32, %arg1: i32, %arg2: i32, %arg3: i32) -> (i32, i32, i32, i32) {
    %0 = arith.addi %arg1, %arg3 : i32
    %c0_i32 = arith.constant 0 : i32
    %c0_i32_0 = arith.constant 0 : i32
    %c0_i32_1 = arith.constant 0 : i32
    return %arg0, %0, %c0_i32, %c0_i32_0 : i32, i32, i32, i32
  }
  func.func @transform_1(%arg0: i32, %arg1: i32, %arg2: i32, %arg3: i32) -> (i32, i32, i32) {
    %c0_i32 = arith.constant 0 : i32
    %c0_i32_0 = arith.constant 0 : i32
    %c0_i32_1 = arith.constant 0 : i32
    return %c0_i32, %c0_i32_0, %arg2 : i32, i32, i32
  }
  func.func @transform_2(%arg0: i32, %arg1: i32, %arg2: i32, %arg3: i32) -> (i32, i32) {
    %c0_i32 = arith.constant 0 : i32
    %c0_i32_0 = arith.constant 0 : i32
    return %c0_i32, %arg2 : i32, i32
  }
  func.func @transform_3(%arg0: i32, %arg1: i32, %arg2: i32, %arg3: i32) -> (i32, i32, i32, i32) {
    %c0_i32 = arith.constant 0 : i32
    %c0_i32_0 = arith.constant 0 : i32
    return %arg0, %arg1, %c0_i32, %arg2 : i32, i32, i32, i32
  }
}

</mosaic_0001>

<bundles_post_ra>
// kernel: reparameterized_conv3d.1
= control target key start
LH: loop header
LB: loop body
LE: loop exit
PB: predicated region body
PF: predicated region fallthrough
CT: control target
= control target key end

     0   :  { %s2936_s12 = smov 0   ;;  %s2938_s13 = smov 0   ;;  %s3610_s0 = inlined_call_operand.vmem [shape: bf16[2,6,224,8], index: 0, kind: input, shape index: {}]   ;;  %s3611_s1 = inlined_call_operand.vmem [shape: bf16[3,72,128], index: 1, kind: input, shape index: {}]   ;;  %s3612_s2 = inlined_call_operand.vmem [shape: f32[1,128], index: 2, kind: input, shape index: {}]   ;;  %s3613_s3 = inlined_call_operand.vmem [shape: bf16[2,4,160,128], index: 3, kind: output, shape index: {}]  }
   0x1   :  { %s2940_s14 = smov 0   ;;  %s2942_s15 = smov 0  }
   0x2   :  { %s2944_s16 = smov 0   ;;  %s2946_s17 = smov 0  }
   0x3   :  { %s2948_s18 = smov 0  }
   0x4 LB: > { %s28_s19 = sadd.s32 1, %s2894_s15  ;;  %s35_s20 = sadd.s32 1, %s2898_s16  ;;  %s2906_s18 = sphi %s2948_s18, %s13_s18   ;;  %s2902_s17 = sphi %s2946_s17, %s3619_s17   ;;  %s2898_s16 = sphi %s2944_s16, %s3618_s16   ;;  %s2894_s15 = sphi %s2942_s15, %s3617_s15   ;;  %s2890_s14 = sphi %s2940_s14, %s3616_s14   ;;  %s2886_s13 = sphi %s2938_s13, %s3615_s13   ;;  %s2882_s12 = sphi %s2936_s12, %s3614_s12  }
   0x5   : > { %p29_p0 = scmp.ge.s32.totalorder %s28_s19, 3  ;;  %p2405_p1 = scmp.ge.s32.totalorder %s2906_s18, 1 }
   0x6   : > { %p194_p2 = scmp.lt.s32.totalorder %s2906_s18, 25  ;;  %s39_s21 = sadd.s32 1, %s2902_s17 }
   0x7   : > { %s3621_s19 = smov (%p29_p0, %s28_s19), 0  ;;  %s3623_s20 = smov (!%p29_p0, %s35_s20), %s2898_s16 }
   0x8   : > { %p195_p3 = pnand %p2405_p1, %p194_p2  ;;  %p37_p4 = scmp.ge.s32.totalorder %s3623_s20, 4 }
   0x9   : > { %s237_s22 = sadd.s32 (!%p195_p3), %s2882_s12, %s2886_s13  ;;  %p238_p6 = scmp.lt.s32.totalorder (!%p195_p3), %s2890_s14, 1  ;;  %vm647_vm0 = vsmask.f32 (!%p195_p3), 7424  ;;  %vm342_vm1 = vsmask.f32 (!%p195_p3), 4352  ;;  %vm451_vm2 = vcmask (!%p195_p3), 64512  }
   0xa   : > { %s3625_s20 = smov (%p37_p4, %s3623_s20), 0  ;;  %s3627_s21 = smov (!%p37_p4, %s39_s21), %s2902_s17 }
   0xb   : > { %p41_p5 = scmp.ge.s32.totalorder %s3627_s21, 2  ;;  %198 = sbr.rel (%p195_p3) target bundleno = 553 (0x229), region = 32  ;;  %vm562_vm3 = vcmask (!%p195_p3), 130112   ;;  %vm1899_vm4 = vcmask (!%p195_p3), 1043456   ;;  %vm762_vm5 = vcmask (!%p195_p3), 195712   ;;  %vm975_vm6 = vcmask (!%p195_p3), 261312  }
   0xc   : > { %p240_p7 = scmp.lt.s32.totalorder (!%p195_p3), %s237_s22, 5  ;;  %p257_p8 = scmp.lt.s32.totalorder (!%p195_p3), %s2886_s13, 3  ;;  %vm1086_vm7 = vcmask (!%p195_p3), 326912   ;;  %vm1285_vm8 = vcmask (!%p195_p3), 392512   ;;  %vm1498_vm9 = vcmask (!%p195_p3), 458112   ;;  %vm1609_vm10 = vcmask (!%p195_p3), 523712  }
   0xd   : > { %s3629_s21 = smov (%p41_p5, %s3627_s21), 0  ;;  %s2908_s10 = smov (!%p195_p3), 8   ;;  %vm1808_vm11 = vcmask (!%p195_p3), 589312   ;;  %vm1868_vm12 = vcmask (!%p195_p3), 588800  }
   0xe   : > { %s2909_s11 = smov (!%p195_p3), 32   ;;  %p2520_p9 = scmp.ne.s32.totalorder (!%p195_p3), %s2882_s12, 0 }
  0x12   : > { %s3631_s14 = smov (!%p238_p6, %s2890_s14), 1  ;;  %s3633_s22 = smov (!%p240_p7, %s237_s22), 5 }
  0x13   : > { %s2684_s23 = smul.u32 168, %s3631_s14  ;;  %s3635_s13 = smov (!%p257_p8, %s2886_s13), 3 }
  0x14   : > { %s2683_s24 = smul.u32 28, %s3633_s22  ;;  %s2912_s22 = smov 40  }
  0x15   : > { %s2686_s26 = smul.u32 80, %s3631_s14  ;;  %s2911_s14 = smov 24  }
  0x16   : > { %s244_s25 = sadd.s32 %s2684_s23, %s2683_s24  ;;  %s2685_s28 = smul.u32 20, %s3635_s13 }
  0x17   : > { %s2406_s27 = sshll.u32 %s244_s25, 2  ;;  %s2910_s13 = smov 16  }
  0x18   : > { %s2984_s4 = scalar_lea.vmem %s3610_s0, %s2406_s27  ;;  %s264_s5 = sadd.s32 %s2686_s26, %s2685_s28 }
  0x19   : > { %v2751_v0 = vld [vmem:[%s2984_s4 + $0x8] sm:$0xff]   ;;  %s2407_s6 = sshll.u32 %s264_s5, 2  ;;  %v2752_v1 = vld [vmem:[%s2984_s4 + $0x18] sm:$0xff]   ;;  %v2753_v2 = vld [vmem:[%s2984_s4 + $0x10] sm:$0xff]   ;;  %s2913_s23 = smov 48  }
  0x1a   : > { %s2991_s9 = scalar_lea.vmem %s3613_s3, %s2407_s6  ;;  %532 = vrot.lane.b32.xlu0 %v2751_v0, %s2908_s10  ;;  %1058 = vrot.lane.b32.xlu1 %v2752_v1, %s2909_s11  ;;  %v2754_v3 = vld [vmem:[%s2984_s4 + $0x8] sm:$0xff]   ;;  %v2755_v4 = vld [vmem:[%s2984_s4 + $0x10] sm:$0xff]   ;;  %s2914_s24 = smov 56  }
  0x1b   : > { %v2756_v5 = vld [vmem:[%s2984_s4 + $0x10] sm:$0xff]   ;;  %v649_v6 = vshrl.u32 %v2754_v3, 16  ;;  %v651_v7 = vshll.u32 %v2754_v3, 16  ;;  %v656_v8 = vshll.u32 %v2755_v4, 16  ;;  %v3001_v9 = vld [vmem:[%s2984_s4 + $0x18] sm:$0xff]   ;;  %v660_v10 = vshrl.u32 %v2755_v4, 16 }
  0x1c   : > { %v2759_v11 = vld [vmem:[%s2984_s4 + $0x14] sm:$0xff]   ;;  %v664_v14 = vshll.u32 %v3001_v9, 16  ;;  %v2760_v15 = vld [vmem:[%s2984_s4 + $0x1c] sm:$0xff]   ;;  %v2758_v16 = vld [vmem:[%s2984_s4 + $0xc] sm:$0xf8]   ;;  %s2915_s25 = smov 64  }
  0x1d   : > { %v653_v12 = vrot.slane %v651_v7, 1  ;;  %v658_v13 = vrot.slane %v656_v8, 1  ;;  %v856_v20 = vshrl.u32 %v2759_v11, 16  ;;  %v848_v21 = vshrl.u32 %v2758_v16, 16  ;;  %v2761_v34 = vld [vmem:[%s2984_s4 + $0x10] sm:$0xff]   ;;  %v2762_v35 = vld [vmem:[%s2984_s4 + $0x18] sm:$0xff]  }
  0x1e   : > { %534 = vrot.lane.b32.xlu0 %v2753_v2, %s2908_s10  ;;  %v3008_v19 = vrot.slane %v664_v14, 1  ;;  %v851_v22 = vshll.u32 %v2758_v16, 16  ;;  %v859_v23 = vshll.u32 %v2759_v11, 16  ;;  %v865_v24 = vshrl.u32 %v2760_v15, 16  ;;  %v3017_v38 = vld [vmem:[%s2984_s4 + $0x20] sm:$0xff]   ;;  %v2769_v7 = vld [vmem:[%s2984_s4 + $0x18] sm:$0xff]  }
  0x1f   : > { %v654_v17 = vor.u32 %v653_v12, %v649_v6  ;;  %v662_v18 = vor.u32 %v660_v10, %v658_v13  ;;  %v858_v26 = vrot.slane %v856_v20, 3  ;;  %v868_v27 = vshll.u32 %v2760_v15, 16  ;;  %v2765_v43 = vld [vmem:[%s2984_s4 + $0x1c] sm:$0xff]   ;;  %v2764_v50 = vld [vmem:[%s2984_s4 + $0x14] sm:$0xf8]   ;;  %v2766_v52 = vld [vmem:[%s2984_s4 + $0x24] sm:$0xff]  }
  0x20   : > { %v850_v28 = vrot.slane %v848_v21, 3  ;;  %v853_v29 = vrot.slane %v851_v22, 4  ;;  %v861_v30 = vrot.slane %v859_v23, 4  ;;  %v867_v31 = vrot.slane %v865_v24, 3  ;;  %v2770_v10 = vld [vmem:[%s2984_s4 + $0x20] sm:$0xff]   ;;  %v2767_v12 = vld [vmem:[%s2984_s4 + $0x18] sm:$0xff]  }
  0x21   : > { %v659_v25 = vsel %vm647_vm0, %v654_v17, %v658_v13  ;;  %v667_v32 = vsel %vm647_vm0, %v662_v18, %v3008_v19  ;;  %v870_v33 = vrot.slane %v868_v27, 4  ;;  %v1172_v40 = vshrl.u32 %v2761_v34, 16  ;;  %v3048_v17 = vld [vmem:[%s2984_s4 + $0x28] sm:$0xff]   ;;  %v2768_v20 = vld [vmem:[%s2984_s4 + $0x20] sm:$0xff]   ;;  %s2546_s26 = smul.u32 36, %s2882_s12 }
  0x22   : > { %1056 = vrot.lane.b32.xlu0 %v2756_v5, %s2909_s11  ;;  %732 = vrot.lane.b32.xlu1 %v659_v25, %s2910_s13  ;;  %v854_v36 = vor.u32 %v853_v29, %v850_v28  ;;  %v862_v37 = vor.u32 %v861_v30, %v858_v26  ;;  %v1174_v41 = vshll.u32 %v2761_v34, 16  ;;  %v1179_v42 = vshll.u32 %v2762_v35, 16  ;;  %v2771_v25 = vld [vmem:[%s2984_s4 + $0x18] sm:$0xff]   ;;  %v2776_v26 = vld [vmem:[%s2984_s4 + $0x20] sm:$0xff]  }
  0x23   : > { %v3019_v39 = vor.u32 %v870_v33, %v867_v31  ;;  %v1183_v45 = vshrl.u32 %v2762_v35, 16  ;;  %v1187_v46 = vshll.u32 %v3017_v38, 16  ;;  %v1379_v51 = vshrl.u32 %v2765_v43, 16  ;;  %v2778_v33 = vld [vmem:[%s2984_s4 + $0x40] sm:$0xff]   ;;  %v3064_v34 = vld [vmem:[%s2984_s4 + $0x28] sm:$0xff]   ;;  %v2772_v35 = vld [vmem:[%s2984_s4 + $0x38] sm:$0xff]   ;;  %s3241_s29 = scalar_lea.vmem %s3611_s1, %s2546_s26 }
  0x24   : > { %v863_v44 = vsel %vm342_vm1, %v854_v36, %v862_v37  ;;  %v1176_v48 = vrot.slane %v1174_v41, 1  ;;  %v1181_v49 = vrot.slane %v1179_v42, 1  ;;  %v1382_v54 = vshll.u32 %v2765_v43, 16  ;;  %v2774_v42 = vld [vmem:[%s2984_s4 + $0x20] sm:$0xff]  }
  0x25   : > { %v872_v47 = vsel %vm342_vm1, %v862_v37, %v3019_v39  ;;  %v3030_v53 = vrot.slane %v1187_v46, 1  ;;  %v1371_v57 = vshrl.u32 %v2764_v50, 16  ;;  %v1374_v58 = vshll.u32 %v2764_v50, 16  ;;  %v3069_v37 = vld [vmem:[%s2984_s4 + $0x48] sm:$0xff]   ;;  %v2775_v50 = vld [vmem:[%s2984_s4 + $0x40] sm:$0xff]  }
  0x26   : > { %734 = vrot.lane.b32.xlu1 %v667_v32, %s2910_s13  ;;  %945 = vrot.lane.b32.xlu0 %v863_v44, %s2911_s14  ;;  %v1177_v55 = vor.u32 %v1176_v48, %v1172_v40  ;;  %v1185_v56 = vor.u32 %v1183_v45, %v1181_v49  ;;  %v1381_v59 = vrot.slane %v1379_v51, 3  ;;  %v1384_v60 = vrot.slane %v1382_v54, 4  ;;  %v2777_v32 = vld [vmem:[%s2984_s4 + $0x38] sm:$0xff]   ;;  %v2781_v40 = vld [vmem:[%s2984_s4 + $0x24] sm:$0xff]  }
  0x27   : > { %v1388_v61 = vshrl.u32 %v2766_v52, 16  ;;  %v1391_v62 = vshll.u32 %v2766_v52, 16  ;;  %v1373_v1 = vrot.slane %v1371_v57, 3  ;;  %v1376_v2 = vrot.slane %v1374_v58, 4  ;;  %v2782_v52 = vld [vmem:[%s2984_s4 + $0x3c] sm:$0xff]  }
  0x28   : > { %v1182_v63 = vsel %vm647_vm0, %v1177_v55, %v1181_v49  ;;  %v1190_v0 = vsel %vm647_vm0, %v1185_v56, %v3030_v53  ;;  %v1385_v3 = vor.u32 %v1384_v60, %v1381_v59  ;;  %v1695_v13 = vshrl.u32 %v2769_v7, 16  ;;  %v2784_v59 = vld [vmem:[%s2984_s4 + $0x2c] sm:$0xff]  }
  0x29   : > { %v1390_v4 = vrot.slane %v1388_v61, 3  ;;  %v1393_v5 = vrot.slane %v1391_v62, 4  ;;  %v1377_v6 = vor.u32 %v1376_v2, %v1373_v1  ;;  %v1697_v14 = vshll.u32 %v2769_v7, 16  ;;  %v2785_v60 = vld [vmem:[%s2984_s4 + $0x4c] sm:$0xff]  }
  0x2a   : > { %947 = vrot.lane.b32.xlu1 %v872_v47, %s2911_s14  ;;  %1255 = vrot.lane.b32.xlu0 %v1182_v63, %s2912_s22  ;;  %v1702_v16 = vshll.u32 %v2770_v10, 16  ;;  %v1706_v22 = vshrl.u32 %v2770_v10, 16  ;;  %v1710_v23 = vshll.u32 %v3048_v17, 16  ;;  %v668_v27 = vshrl.u32 %v3001_v9, 16 }
  0x2b   : > { %v3039_v8 = vor.u32 %v1393_v5, %v1390_v4  ;;  %v1386_v11 = vsel %vm342_vm1, %v1377_v6, %v1385_v3  ;;  %v1699_v18 = vrot.slane %v1697_v14, 1  ;;  %v672_v31 = vshll.u32 %v2776_v26, 16 }
  0x2c   : > { %v1704_v21 = vrot.slane %v1702_v16, 1  ;;  %v3059_v30 = vrot.slane %v1710_v23, 1  ;;  %v696_v36 = vshll.u32 %v2777_v32, 16  ;;  %v704_v9 = vshll.u32 %v2778_v33, 16 }
  0x2d   : > { %v1395_v15 = vsel %vm342_vm1, %v1385_v3, %v3039_v8  ;;  %v1700_v24 = vor.u32 %v1699_v18, %v1695_v13  ;;  %v670_v43 = vor.u32 %v668_v27, %v3008_v19  ;;  %v674_v44 = vrot.slane %v672_v31, 1  ;;  %v2783_v19 = vld [vmem:[%s2984_s4 + $0x44] sm:$0xff]  }
  0x2e   : > { %1257 = vrot.lane.b32.xlu1 %v1190_v0, %s2912_s22  ;;  %1468 = vrot.lane.b32.xlu0 %v1386_v11, %s2913_s23  ;;  %v1708_v29 = vor.u32 %v1706_v22, %v1704_v21  ;;  %v676_v45 = vshrl.u32 %v2776_v26, 16  ;;  %v3077_v46 = vrot.slane %v696_v36, 1  ;;  %v700_v47 = vshrl.u32 %v2777_v32, 16  ;;  %v2790_v32 = vld [vmem:[%s2984_s4 + $0x28] sm:$0xff]   ;;  %v3115_v36 = vld [vmem:[%s2984_s4 + $0x30] sm:$0xff]  }
  0x2f   : > { %v1705_v28 = vsel %vm647_vm0, %v1700_v24, %v1704_v21  ;;  %v680_v48 = vshll.u32 %v3064_v34, 16  ;;  %v708_v49 = vshrl.u32 %v2778_v33, 16  ;;  %v706_v51 = vrot.slane %v704_v9, 1  ;;  %v2791_v33 = vld [vmem:[%s2984_s4 + $0x40] sm:$0xff]  }
  0x30   : > { %v1713_v41 = vsel %vm647_vm0, %v1708_v29, %v3059_v30  ;;  %v712_v54 = vshll.u32 %v3069_v37, 16  ;;  %v874_v55 = vshrl.u32 %v2781_v40, 16  ;;  %v877_v56 = vshll.u32 %v2781_v40, 16 }
  0x31   : > { %v901_v57 = vshrl.u32 %v2782_v52, 16  ;;  %v904_v58 = vshll.u32 %v2782_v52, 16  ;;  %v675_v61 = vsel %vm647_vm0, %v670_v43, %v674_v44  ;;  %v702_v62 = vor.u32 %v700_v47, %v3077_v46  ;;  %v2787_v52 = vld [vmem:[%s2984_s4 + $0x40] sm:$0xff]  }
  0x32   : > { %1470 = vrot.lane.b32.xlu1 %v1395_v15, %s2913_s23  ;;  %1579 = vrot.lane.b32.xlu0 %v2767_v12, %s2914_s24  ;;  %v910_v63 = vshrl.u32 %v2783_v19, 16  ;;  %v913_v0 = vshll.u32 %v2783_v19, 16  ;;  %v678_v1 = vor.u32 %v676_v45, %v674_v44  ;;  %v3091_v2 = vrot.slane %v680_v48, 1 }
  0x33   : > { %v883_v3 = vshrl.u32 %v2784_v59, 16  ;;  %v886_v4 = vshll.u32 %v2784_v59, 16  ;;  %v710_v5 = vor.u32 %v708_v49, %v706_v51  ;;  %v3093_v6 = vrot.slane %v712_v54, 1  ;;  %v2786_v49 = vld [vmem:[%s2984_s4 + $0x20] sm:$0xff]   ;;  %v2797_v59 = vld [vmem:[%s2984_s4 + $0x4c] sm:$0xff]  }
  0x34   : > { %v876_v7 = vrot.slane %v874_v55, 3  ;;  %v879_v10 = vrot.slane %v877_v56, 4  ;;  %v903_v11 = vrot.slane %v901_v57, 3  ;;  %v906_v12 = vrot.slane %v904_v58, 4  ;;  %v2796_v55 = vld [vmem:[%s2984_s4 + $0x44] sm:$0xff]  }
  0x35   : > { %v912_v13 = vrot.slane %v910_v63, 3  ;;  %v915_v14 = vrot.slane %v913_v0, 4  ;;  %v707_v15 = vsel %vm647_vm0, %v702_v62, %v706_v51  ;;  %v919_v16 = vshrl.u32 %v2785_v60, 16  ;;  %v2795_v51 = vld [vmem:[%s2984_s4 + $0x2c] sm:$0xff]  }
  0x36   : > { %1581 = vrot.lane.b32.xlu1 %v2768_v20, %s2914_s24  ;;  %1778 = vrot.lane.b32.xlu0 %v1705_v28, %s2915_s25  ;;  %v922_v18 = vshll.u32 %v2785_v60, 16  ;;  %v885_v20 = vrot.slane %v883_v3, 3  ;;  %v888_v21 = vrot.slane %v886_v4, 4  ;;  %v683_v22 = vsel %vm647_vm0, %v678_v1, %v3091_v2  ;;  %v2788_v56 = vld [vmem:[%s2984_s4 + $0x28] sm:$0xff]  }
  0x37   : > { %v880_v23 = vor.u32 %v879_v10, %v876_v7  ;;  %v715_v24 = vsel %vm647_vm0, %v710_v5, %v3093_v6  ;;  %v916_v26 = vor.u32 %v915_v14, %v912_v13  ;;  %v921_v27 = vrot.slane %v919_v16, 3  ;;  %v2789_v63 = vld [vmem:[%s2984_s4 + $0x48] sm:$0xff]   ;;  %v2798_v5 = vld [vmem:[%s2984_s4 + $0x34] sm:$0xff]  }
  0x38   : > { %v924_v28 = vrot.slane %v922_v18, 4  ;;  %v3108_v31 = vor.u32 %v888_v21, %v885_v20  ;;  %v1219_v43 = vshll.u32 %v2791_v33, 16  ;;  %v1203_v47 = vshll.u32 %v3115_v36, 16  ;;  %v2799_v13 = vld [vmem:[%s2984_s4 + $0x54] sm:$0xff]  }
  0x39   : > { %v881_v29 = vsel %vm342_vm1, %v3019_v39, %v880_v23  ;;  %v1223_v54 = vshrl.u32 %v2791_v33, 16  ;;  %v1199_v58 = vshrl.u32 %v2790_v32, 16  ;;  %v1397_v1 = vshrl.u32 %v2795_v51, 16 }
  0x3a   : > { %536 = vrot.lane.b32.xlu1 %v2771_v25, %s2908_s10  ;;  %544 = vrot.lane.b32.xlu0 %v2772_v35, %s2908_s10  ;;  %v3103_v25 = vor.u32 %v906_v12, %v903_v11  ;;  %v2792_v35 = vld [vmem:[%s2984_s4 + $0x48] sm:$0xff]   ;;  %v3119_v40 = vor.u32 %v924_v28, %v921_v27  ;;  %v890_v39 = vsel %vm342_vm1, %v880_v23, %v3108_v31  ;;  %v3140_v57 = vrot.slane %v1219_v43, 1 }
  0x3b   : > { %v1227_v44 = vshll.u32 %v2792_v35, 16  ;;  %v1231_v62 = vshrl.u32 %v2792_v35, 16  ;;  %v1400_v3 = vshll.u32 %v2795_v51, 16  ;;  %v1424_v4 = vshrl.u32 %v2796_v55, 16 }
  0x3c   : > { %v917_v9 = vsel %vm342_vm1, %v3103_v25, %v916_v26  ;;  %v926_v45 = vsel %vm342_vm1, %v916_v26, %v3119_v40  ;;  %v1225_v7 = vor.u32 %v1223_v54, %v3140_v57  ;;  %v1427_v10 = vshll.u32 %v2796_v55, 16  ;;  %v3185_v55 = vld [vmem:[%s2984_s4 + $0x50] sm:$0xff]  }
  0x3d   : > { %v1229_v60 = vrot.slane %v1227_v44, 1  ;;  %v1433_v11 = vshrl.u32 %v2797_v59, 16  ;;  %v1436_v12 = vshll.u32 %v2797_v59, 16  ;;  %v1399_v16 = vrot.slane %v1397_v1, 3 }
  0x3e   : > { %1780 = vrot.lane.b32.xlu1 %v1713_v41, %s2915_s25  ;;  %538 = vrot.lane.b32.xlu0 %v2774_v42, %s2908_s10  ;;  %v3122_v41 = vld [vmem:[%s2984_s4 + $0x50] sm:$0xff]   ;;  %v1195_v42 = vshll.u32 %v2790_v32, 16  ;;  %v1402_v18 = vrot.slane %v1400_v3, 4  ;;  %v1409_v20 = vshll.u32 %v2798_v5, 16  ;;  %v1426_v23 = vrot.slane %v1424_v4, 3 }
  0x3f   : > { %v1235_v48 = vshll.u32 %v3122_v41, 16  ;;  %v1230_v21 = vsel %vm647_vm0, %v1225_v7, %v1229_v60  ;;  %v1435_v26 = vrot.slane %v1433_v11, 3  ;;  %v1438_v27 = vrot.slane %v1436_v12, 4  ;;  %v2802_v11 = vld [vmem:[%s2984_s4 + $0x30] sm:$0xff]  }
  0x40   : > { %v1197_v19 = vrot.slane %v1195_v42, 1  ;;  %v1442_v28 = vshrl.u32 %v2799_v13, 16  ;;  %v1403_v33 = vor.u32 %v1402_v18, %v1399_v16  ;;  %v1750_v1 = vshll.u32 %v3185_v55, 16  ;;  %v3205_v18 = vld [vmem:[%s2984_s4 + $0x38] sm:$0xff]  }
  0x41   : > { %v1439_v43 = vor.u32 %v1438_v27, %v1435_v26 }
  0x42   : > { %546 = vrot.lane.b32.xlu1 %v2775_v50, %s2908_s10  ;;  %736 = vrot.lane.b32.xlu0 %v675_v61, %s2910_s13  ;;  %v1191_v50 = vshrl.u32 %v3017_v38, 16  ;;  %v3143_v61 = vrot.slane %v1203_v47, 1  ;;  %v3145_v38 = vrot.slane %v1235_v48, 1  ;;  %v1444_v44 = vrot.slane %v1442_v28, 3 }
  0x43   : > { %v1404_v47 = vsel %vm342_vm1, %v3039_v8, %v1403_v33  ;;  %v1714_v8 = vshrl.u32 %v3048_v17, 16  ;;  %v1752_v26 = vrot.slane %v1750_v1, 1 }
  0x44   : > { %v1193_v0 = vor.u32 %v1191_v50, %v3030_v53  ;;  %v1406_v53 = vshrl.u32 %v2798_v5, 16 }
  0x45   : > { %v1716_v16 = vor.u32 %v1714_v8, %v3059_v30  ;;  %v2816_v8 = vld [vmem:[%s2984_s4 + $0x34] sm:$0xff]  }
  0x46   : > { %744 = vrot.lane.b32.xlu1 %v707_v15, %s2910_s13  ;;  %738 = vrot.lane.b32.xlu0 %v683_v22, %s2910_s13  ;;  %v1198_v14 = vsel %vm647_vm0, %v1193_v0, %v1197_v19  ;;  %v1201_v15 = vor.u32 %v1199_v58, %v1197_v19  ;;  %v1233_v22 = vor.u32 %v1231_v62, %v1229_v60  ;;  %v1408_v35 = vrot.slane %v1406_v53, 3  ;;  %v2818_v58 = vld [vmem:[%s2984_s4 + $0xc] sm:$0xff]   ;;  %v2817_v60 = vld [vmem:[%s2984_s4 + $0x4] sm:$0xf8]  }
  0x47   : > { %v2801_v62 = vld [vmem:[%s2984_s4 + $0x48] sm:$0xff]   ;;  %v352_v0 = vshrl.u32 %v2818_v58, 16  ;;  %v344_v3 = vshrl.u32 %v2817_v60, 16  ;;  %v347_v4 = vshll.u32 %v2817_v60, 16  ;;  %v355_v5 = vshll.u32 %v2818_v58, 16 }
  0x48   : > { %v1206_v32 = vsel %vm647_vm0, %v1201_v15, %v3143_v61 }
  0x49   : > { %v354_v7 = vrot.slane %v352_v0, 3  ;;  %v357_v15 = vrot.slane %v355_v5, 4 }
  0x4a   : > { %746 = vrot.lane.b32.xlu1 %v715_v24, %s2910_s13  ;;  %949 = vrot.lane.b32.xlu0 %v881_v29, %s2911_s14  ;;  %v1429_v24 = vrot.slane %v1427_v10, 4  ;;  %v1445_v29 = vshll.u32 %v2799_v13, 16  ;;  %v2820_v10 = vld [vmem:[%s2984_s4 + $0x14] sm:$0xff]   ;;  %v346_v13 = vrot.slane %v344_v3, 3  ;;  %v895_v3 = vshll.u32 %v2816_v8, 16 }
  0x4b   : > { %v361_v53 = vshrl.u32 %v2820_v10, 16 }
  0x4c   : > { %v3164_v42 = vor.u32 %v1429_v24, %v1426_v23  ;;  %v364_v23 = vshll.u32 %v2820_v10, 16  ;;  %v2803_v24 = vld [vmem:[%s2984_s4 + $0x50] sm:$0xff]  }
  0x4d   : > { %v363_v28 = vrot.slane %v361_v53, 3 }
  0x4e   : > { %957 = vrot.lane.b32.xlu1 %v917_v9, %s2911_s14  ;;  %951 = vrot.lane.b32.xlu0 %v890_v39, %s2911_s14  ;;  %v1411_v9 = vrot.slane %v1409_v20, 4  ;;  %v1238_v39 = vsel %vm647_vm0, %v1233_v22, %v3145_v38  ;;  %v1440_v50 = vsel %vm342_vm1, %v3164_v42, %v1439_v43  ;;  %v358_v22 = vor.u32 %v357_v15, %v354_v7  ;;  %v2811_v15 = vld [vmem:[%s2984_s4 + $0x30] sm:$0xff]  }
  0x50   : > { %v3169_v48 = vor.u32 %v1411_v9, %v1408_v35  ;;  %v1726_v35 = vshll.u32 %v3205_v18, 16  ;;  %v3218_v9 = vld [vmem:[%s2984_s4 + $0x30] sm:$0xff]  }
  0x51   : > { %v688_v60 = vshll.u32 %v3218_v9, 16 }
  0x52   : > { %959 = vrot.lane.b32.xlu1 %v926_v45, %s2911_s14  ;;  %1060 = vrot.lane.b32.xlu0 %v2786_v49, %s2909_s11  ;;  %v1447_v45 = vrot.slane %v1445_v29, 4  ;;  %v2805_v49 = vld [vmem:[%s2984_s4 + $0x48] sm:$0xff]   ;;  %v1413_v54 = vsel %vm342_vm1, %v1403_v33, %v3169_v48  ;;  %v3212_v29 = vld [vmem:[%s2984_s4 + $0x58] sm:$0xff]   ;;  %v366_v33 = vrot.slane %v364_v23, 4 }
  0x53   : > { %v1742_v19 = vshll.u32 %v2805_v49, 16  ;;  %v1746_v17 = vshrl.u32 %v2805_v49, 16  ;;  %v690_v10 = vrot.slane %v688_v60, 1  ;;  %v2812_v23 = vld [vmem:[%s2984_s4 + $0x50] sm:$0xff]  }
  0x54   : > { %v3175_v51 = vor.u32 %v1447_v45, %v1444_v44  ;;  %v3224_v44 = vld [vmem:[%s2984_s4 + $0x50] sm:$0xff]   ;;  %v3226_v45 = vor.u32 %v366_v33, %v363_v28 }
  0x55   : > { %v3200_v12 = vrot.slane %v1742_v19, 1  ;;  %v2819_v19 = vld [vmem:[%s2984_s4 + $0x54] sm:$0xff]  }
  0x56   : > { %1068 = vrot.lane.b32.xlu1 %v2787_v52, %s2909_s11  ;;  %1062 = vrot.lane.b32.xlu0 %v2788_v56, %s2909_s11  ;;  %v3179_v52 = vld [vmem:[%s2984_s4 + $0x30] sm:$0xff]   ;;  %v2800_v56 = vld [vmem:[%s2984_s4 + $0x28] sm:$0xff]   ;;  %v1449_v59 = vsel %vm342_vm1, %v1439_v43, %v3175_v51  ;;  %v931_v5 = vshll.u32 %v2819_v19, 16 }
  0x57   : > { %v1722_v27 = vshrl.u32 %v3179_v52, 16  ;;  %v1748_v30 = vor.u32 %v1746_v17, %v3200_v12  ;;  %v2830_v17 = vld [vmem:[%s3241_s29] sm:$0xff]  }
  0x58   : > { %2641 = vmatprep.subr.bf16.mxu0 %v2830_v17  ;;  %2671 = vmatprep.subr.bf16.mxu1 %v2830_v17  ;;  %v933_v28 = vrot.slane %v931_v5, 4 }
  0x59   : > { %v1753_v49 = vsel %vm647_vm0, %v1748_v30, %v1752_v26  ;;  %2642 = vmatpush3.bf16.msra.mxu0 %v2830_v17  ;;  %2676 = vmatpush3.bf16.msra.mxu1 %v2830_v17  ;;  %v2835_v30 = vld [vmem:[%s2984_s4 + $0x1c] sm:$0xff]  }
  0x5a   : > { %1070 = vrot.lane.b32.xlu1 %v2789_v63, %s2909_s11  ;;  %1259 = vrot.lane.b32.xlu0 %v1198_v14, %s2912_s22  ;;  %v1718_v63 = vshll.u32 %v3179_v52, 16  ;;  %v349_v14 = vrot.slane %v347_v4, 4  ;;  %v1754_v52 = vshrl.u32 %v3185_v55, 16  ;;  %v2808_v55 = vld [vmem:[%s2984_s4 + $0x48] sm:$0xff]   ;;  %v928_v4 = vshrl.u32 %v2819_v19, 16 }
  0x5c   : > { %v1720_v20 = vrot.slane %v1718_v63, 1  ;;  %v1756_v0 = vor.u32 %v1754_v52, %v1752_v26  ;;  %v897_v26 = vrot.slane %v895_v3, 4 }
  0x5e   : > { %1267 = vrot.lane.b32.xlu1 %v1230_v21, %s2912_s22  ;;  %1261 = vrot.lane.b32.xlu0 %v1206_v32, %s2912_s22  ;;  %v350_v21 = vor.u32 %v349_v14, %v346_v13  ;;  %v1721_v43 = vsel %vm647_vm0, %v1716_v16, %v1720_v20  ;;  %v1724_v58 = vor.u32 %v1722_v27, %v1720_v20  ;;  %v724_v13 = vshrl.u32 %v3224_v44, 16  ;;  %v2832_v14 = vld [vmem:[%s3241_s29 + $0x8] sm:$0xff]   ;;  %v3265_v20 = vld [vmem:[%s2984_s4 + $0x5c] ss:$0 sps:$4 sm:$0xff]  }
  0x5f   : > { %2643 = vmatprep.subr.bf16.mxu0 %v2832_v14  ;;  %2672 = vmatprep.subr.bf16.mxu1 %v2832_v14  ;;  %v930_v27 = vrot.slane %v928_v4, 3 }
  0x60   : > { %v359_v32 = vsel %vm342_vm1, %v350_v21, %v358_v22  ;;  %2644 = vmatpush3.bf16.msra.mxu0 %v2832_v14  ;;  %2677 = vmatpush3.bf16.msra.mxu1 %v2832_v14 }
  0x61   : > { %452 = vst.msk [vmem:[#allocation3] sm:$0xff] %vm451_vm2, %v359_v32  ;;  %v2836_v32 = vld [vmem:[%s3241_s29 + $0x10] sm:$0xff]   ;;  %v934_v14 = vor.u32 %v933_v28, %v930_v27 }
  0x62   : > { %1269 = vrot.lane.b32.xlu1 %v1238_v39, %s2912_s22  ;;  %1472 = vrot.lane.b32.xlu0 %v1404_v47, %s2913_s23  ;;  %v2815_v39 = vld [vmem:[%s2984_s4 + $0x58] ss:$0 sps:$4 sm:$0x11]   ;;  %v684_v47 = vshrl.u32 %v3064_v34, 16  ;;  %v716_v34 = vshrl.u32 %v3069_v37, 16  ;;  %v892_v37 = vshrl.u32 %v2816_v8, 16 }
  0x63   : > { %v728_v63 = vshll.u32 %v2815_v39, 16  ;;  %2645 = vmatprep.subr.bf16.mxu0 %v2836_v32  ;;  %v2837_v39 = vld [vmem:[%s2984_s4 + $0x34] sm:$0xff]   ;;  %2673 = vmatprep.subr.bf16.mxu1 %v2836_v32  ;;  %v2849_v28 = vld [vmem:[%s2984_s4 + $0x2c] sm:$0xff]  }
  0x64   : > { %v718_v33 = vor.u32 %v716_v34, %v3093_v6  ;;  %v397_v52 = vshrl.u32 %v2837_v39, 16  ;;  %2646 = vmatpush3.bf16.msra.mxu0 %v2836_v32  ;;  %2678 = vmatpush3.bf16.msra.mxu1 %v2836_v32 }
  0x65   : > { %v730_v53 = vrot.slane %v728_v63, 1 }
  0x66   : > { %1480 = vrot.lane.b32.xlu1 %v1440_v50, %s2913_s23  ;;  %1474 = vrot.lane.b32.xlu0 %v1413_v54, %s2913_s23  ;;  %v2807_v50 = vld [vmem:[%s2984_s4 + $0x28] sm:$0xff]   ;;  %v1758_v54 = vshll.u32 %v3212_v29, 16 }
  0x68   : > { %v3254_v1 = vrot.slane %v1758_v54, 1  ;;  %v400_v54 = vshll.u32 %v2837_v39, 16 }
  0x6a   : > { %1482 = vrot.lane.b32.xlu1 %v1449_v59, %s2913_s23  ;;  %1583 = vrot.lane.b32.xlu0 %v2800_v56, %s2914_s24  ;;  %v368_v56 = vsel %vm342_vm1, %v358_v22, %v3226_v45  ;;  %v3248_v59 = vrot.slane %v1726_v35, 1  ;;  %v1761_v21 = vsel %vm647_vm0, %v1756_v0, %v3254_v1  ;;  %v686_v22 = vor.u32 %v684_v47, %v3091_v2  ;;  %v2842_v0 = vld [vmem:[%s2984_s4 + $0x24] sm:$0xff]  }
  0x6b   : > { %453 = vst.msk [vmem:[#allocation3 + $0x8] sm:$0xff] %vm451_vm2, %v368_v56  ;;  %v937_v2 = vshrl.u32 %v3265_v20, 16  ;;  %v940_v35 = vshll.u32 %v3265_v20, 16 }
  0x6c   : > { %v1729_v7 = vsel %vm647_vm0, %v1724_v58, %v3248_v59  ;;  %v691_v47 = vsel %vm647_vm0, %v686_v22, %v690_v10  ;;  %v2841_v58 = vld [vmem:[%s3241_s29 + $0x18] sm:$0xff]  }
  0x6d   : > { %2647 = vmatprep.subr.bf16.mxu0 %v2841_v58  ;;  %2674 = vmatprep.subr.bf16.mxu1 %v2841_v58 }
  0x6e   : > { %1591 = vrot.lane.b32.xlu1 %v2801_v62, %s2914_s24  ;;  %1585 = vrot.lane.b32.xlu0 %v2802_v11, %s2914_s24  ;;  %v720_v62 = vshll.u32 %v3224_v44, 16  ;;  %v692_v11 = vshrl.u32 %v3218_v9, 16  ;;  %v370_v9 = vshrl.u32 %v2835_v30, 16  ;;  %v2838_v44 = vld [vmem:[%s2984_s4 + $0x3c] sm:$0xff]  }
  0x6f   : > { %v406_v8 = vshrl.u32 %v2838_v44, 16  ;;  %v409_v56 = vshll.u32 %v2838_v44, 16  ;;  %2648 = vmatpush3.bf16.msra.mxu0 %v2841_v58  ;;  %2679 = vmatpush3.bf16.msra.mxu1 %v2841_v58  ;;  %v3315_v44 = vld [vmem:[%s2984_s4 + $0x38] sm:$0xff]   ;;  %v2823_v58 = vld [vmem:[%s2984_s4 + $0x50] sm:$0xff]  }
  0x70   : > { %v722_v16 = vrot.slane %v720_v62, 1  ;;  %v402_v62 = vrot.slane %v400_v54, 4  ;;  %v1239_v54 = vshrl.u32 %v3122_v41, 16 }
  0x71   : > { %v408_v63 = vrot.slane %v406_v8, 3  ;;  %v411_v17 = vrot.slane %v409_v56, 4  ;;  %v2822_v56 = vld [vmem:[%s2984_s4 + $0x30] sm:$0xff]  }
  0x72   : > { %1593 = vrot.lane.b32.xlu1 %v2803_v24, %s2914_s24  ;;  %1782 = vrot.lane.b32.xlu0 %v1721_v43, %s2915_s25  ;;  %v894_v24 = vrot.slane %v892_v37, 3  ;;  %v373_v43 = vshll.u32 %v2835_v30, 16  ;;  %v723_v34 = vsel %vm647_vm0, %v718_v33, %v722_v16  ;;  %v726_v19 = vor.u32 %v724_v13, %v722_v16 }
  0x73   : > { %v939_v13 = vrot.slane %v937_v2, 3  ;;  %v935_v30 = vsel %vm342_vm1, %v3119_v40, %v934_v14 }
  0x74   : > { %v375_v6 = vrot.slane %v373_v43, 4  ;;  %v898_v3 = vor.u32 %v897_v26, %v894_v24 }
  0x76   : > { %1790 = vrot.lane.b32.xlu1 %v1753_v49, %s2915_s25  ;;  %540 = vrot.lane.b32.xlu0 %v2807_v50, %s2908_s10  ;;  %v694_v49 = vor.u32 %v692_v11, %v690_v10  ;;  %v372_v50 = vrot.slane %v370_v9, 3  ;;  %v379_v10 = vshrl.u32 %v2842_v0, 16  ;;  %v731_v11 = vsel %vm647_vm0, %v726_v19, %v730_v53  ;;  %v2850_v9 = vld [vmem:[%s2984_s4 + $0x4c] sm:$0xff]  }
  0x77   : > { %v899_v53 = vsel %vm342_vm1, %v3108_v31, %v898_v3  ;;  %v908_v39 = vsel %vm342_vm1, %v898_v3, %v3103_v25  ;;  %v424_v8 = vshrl.u32 %v2850_v9, 16  ;;  %v427_v41 = vshll.u32 %v2850_v9, 16 }
  0x78   : > { %v376_v60 = vor.u32 %v375_v6, %v372_v50  ;;  %v699_v37 = vsel %vm647_vm0, %v694_v49, %v3077_v46  ;;  %v382_v46 = vshll.u32 %v2842_v0, 16  ;;  %v381_v16 = vrot.slane %v379_v10, 3  ;;  %v3324_v49 = vld [vmem:[%s2984_s4 + $0x58] sm:$0xff]   ;;  %v2828_v0 = vld [vmem:[%s2984_s4 + $0x60] ss:$0 sps:$4 sm:$0x11]  }
  0x79   : > { %v388_v50 = vshrl.u32 %v2849_v28, 16 }
  0x7a   : > { %548 = vrot.lane.b32.xlu1 %v2808_v55, %s2908_s10  ;;  %1784 = vrot.lane.b32.xlu0 %v1729_v7, %s2915_s25  ;;  %v399_v55 = vrot.slane %v397_v52, 3  ;;  %v377_v4 = vsel %vm342_vm1, %v3226_v45, %v376_v60  ;;  %v412_v7 = vor.u32 %v411_v17, %v408_v63  ;;  %v384_v20 = vrot.slane %v382_v46, 4  ;;  %v2831_v46 = vld [vmem:[%s2984_s4 + $0x5c] sm:$0xff]  }
  0x7b   : > { %454 = vst.msk [vmem:[#allocation3 + $0x10] sm:$0xff] %vm451_vm2, %v377_v4  ;;  %v391_v52 = vshll.u32 %v2849_v28, 16  ;;  %v390_v19 = vrot.slane %v388_v50, 3  ;;  %v426_v63 = vrot.slane %v424_v8, 3  ;;  %v1243_v17 = vshll.u32 %v3324_v49, 16 }
  0x7c   : > { %v3291_v5 = vor.u32 %v402_v62, %v399_v55  ;;  %v385_v24 = vor.u32 %v384_v20, %v381_v16  ;;  %v2829_v62 = vld [vmem:[%s2984_s4 + $0x3c] sm:$0xff]  }
  0x7d   : > { %v393_v55 = vrot.slane %v391_v52, 4 }
  0x7e   : > { %1792 = vrot.lane.b32.xlu1 %v1761_v21, %s2915_s25  ;;  %542 = vrot.lane.b32.xlu0 %v2811_v15, %s2908_s10  ;;  %v942_v15 = vrot.slane %v940_v35, 4  ;;  %v413_v45 = vsel %vm342_vm1, %v3291_v5, %v412_v7  ;;  %v2845_v21 = vld [vmem:[%s2984_s4 + $0x44] sm:$0xff]   ;;  %v386_v31 = vsel %vm342_vm1, %v376_v60, %v385_v24  ;;  %v1211_v60 = vshll.u32 %v3315_v44, 16 }
  0x7f   : > { %458 = vst.msk [vmem:[#allocation3 + $0x30] sm:$0xff] %vm451_vm2, %v413_v45  ;;  %v415_v26 = vshrl.u32 %v2845_v21, 16  ;;  %v418_v27 = vshll.u32 %v2845_v21, 16  ;;  %455 = vst.msk [vmem:[#allocation3 + $0x18] sm:$0xff] %vm451_vm2, %v386_v31  ;;  %v2824_v45 = vld [vmem:[%s2984_s4 + $0x38] sm:$0xff]  }
  0x80   : > { %v943_v32 = vor.u32 %v942_v15, %v939_v13  ;;  %v1215_v13 = vshrl.u32 %v3315_v44, 16 }
  0x81   : > { %v417_v2 = vrot.slane %v415_v26, 3  ;;  %v420_v35 = vrot.slane %v418_v27, 4  ;;  %v2825_v26 = vld [vmem:[%s2984_s4 + $0x58] sm:$0xff]   ;;  %v1247_v27 = vshrl.u32 %v3324_v49, 16 }
  0x82   : > { %550 = vrot.lane.b32.xlu1 %v2812_v23, %s2908_s10  ;;  %740 = vrot.lane.b32.xlu0 %v691_v47, %s2910_s13  ;;  %v2846_v23 = vld [vmem:[%s3241_s29 + $0x20] ss:$0 sps:$4 sm:$0xff]   ;;  %v1207_v47 = vshrl.u32 %v3115_v36, 16  ;;  %v944_v6 = vsel %vm342_vm1, %v934_v14, %v943_v32  ;;  %v2851_v36 = vld [vmem:[%s2984_s4 + $0x54] ss:$0 sps:$4 sm:$0xff]   ;;  %v429_v14 = vrot.slane %v427_v41, 4 }
  0x83   : > { %2681 = vmatprep.subr.msk.bf16.mxu0 %vm1899_vm4, %v2846_v23  ;;  %v1901_v33 = vsel %vm1899_vm4, %v2846_v23, 0  ;;  %2682 = vmatprep.subr.msk.bf16.mxu1 %vm1899_vm4, %v2846_v23  ;;  %v421_v25 = vor.u32 %v420_v35, %v417_v2  ;;  %v433_v3 = vshrl.u32 %v2851_v36, 16  ;;  %v436_v4 = vshll.u32 %v2851_v36, 16 }
  0x84   : > { %2650 = vmatpush3.bf16.msra.mxu0 %v1901_v33  ;;  %2680 = vmatpush3.bf16.msra.mxu1 %v1901_v33  ;;  %v1209_v10 = vor.u32 %v1207_v47, %v3143_v61  ;;  %v1213_v61 = vrot.slane %v1211_v60, 1  ;;  %v430_v23 = vor.u32 %v429_v14, %v426_v63  ;;  %v1454_v32 = vshll.u32 %v2831_v46, 16  ;;  %v2833_v33 = vld [vmem:[%s2984_s4 + $0x64] ss:$0 sps:$4 sm:$0xff]  }
  0x85   : > { %v435_v21 = vrot.slane %v433_v3, 3  ;;  %v1463_v8 = vshll.u32 %v2833_v33, 16  ;;  %v1762_v14 = vshrl.u32 %v3212_v29, 16 }
  0x86   : > { %748 = vrot.lane.b32.xlu1 %v723_v34, %s2910_s13  ;;  %742 = vrot.lane.b32.xlu0 %v699_v37, %s2910_s13  ;;  %v422_v34 = vsel %vm342_vm1, %v412_v7, %v421_v25  ;;  %v394_v37 = vor.u32 %v393_v55, %v390_v19  ;;  %v431_v31 = vsel %vm342_vm1, %v421_v25, %v430_v23 }
  0x87   : > { %459 = vst.msk [vmem:[#allocation3 + $0x38] sm:$0xff] %vm451_vm2, %v422_v34  ;;  %460 = vst.msk [vmem:[#allocation3 + $0x40] sm:$0xff] %vm451_vm2, %v431_v31  ;;  %v1764_v29 = vor.u32 %v1762_v14, %v3254_v1 }
  0x88   : > { %v395_v16 = vsel %vm342_vm1, %v385_v24, %v394_v37  ;;  %v404_v20 = vsel %vm342_vm1, %v394_v37, %v3291_v5  ;;  %v1245_v24 = vrot.slane %v1243_v17, 1  ;;  %v1251_v5 = vshll.u32 %v2828_v0, 16  ;;  %v2844_v37 = vld [vmem:[%s2984_s4 + $0x40] sm:$0xff]  }
  0x89   : > { %456 = vst.msk [vmem:[#allocation3 + $0x20] sm:$0xff] %vm451_vm2, %v395_v16  ;;  %457 = vst.msk [vmem:[#allocation3 + $0x28] sm:$0xff] %vm451_vm2, %v404_v20  ;;  %v2840_v20 = vld [vmem:[%s2984_s4 + $0x40] sm:$0xff]  }
  0x8a   : > { %750 = vrot.lane.b32.xlu1 %v731_v11, %s2910_s13  ;;  %953 = vrot.lane.b32.xlu0 %v899_v53, %s2911_s14  ;;  %v1241_v11 = vor.u32 %v1239_v54, %v3145_v38  ;;  %v438_v53 = vrot.slane %v436_v4, 4  ;;  %v1415_v38 = vshrl.u32 %v2829_v62, 16  ;;  %v1249_v25 = vor.u32 %v1247_v27, %v1245_v24  ;;  %v2847_v4 = vld [vmem:[%s2984_s4 + $0x60] sm:$0xff]  }
  0x8b   : > { %v1253_v50 = vrot.slane %v1251_v5, 1  ;;  %v1460_v54 = vshrl.u32 %v2833_v33, 16 }
  0x8c   : > { %v533_v22 = vpop.permute.xlu0 %532  ;;  %v3319_v40 = vpop.permute.xlu1 %1058  ;;  %v439_v28 = vor.u32 %v438_v53, %v435_v21  ;;  %v1417_v44 = vrot.slane %v1415_v38, 3  ;;  %v1246_v49 = vsel %vm647_vm0, %v1241_v11, %v1245_v24  ;;  %v1734_v11 = vshll.u32 %v2844_v37, 16  ;;  %v2843_v38 = vld [vmem:[%s2984_s4 + $0x60] sm:$0xff]  }
  0x8d   : > { %563 = vst.msk [vmem:[#allocation3] sm:$0xff] %vm562_vm3, %v533_v22  ;;  %v1418_v22 = vshll.u32 %v2829_v62, 16  ;;  %v1254_v36 = vsel %vm647_vm0, %v1249_v25, %v1253_v50  ;;  %v1462_v60 = vrot.slane %v1460_v54, 3  ;;  %v1465_v62 = vrot.slane %v1463_v8, 4 }
  0x8e   : > { %961 = vrot.lane.b32.xlu1 %v935_v30, %s2911_s14  ;;  %955 = vrot.lane.b32.xlu0 %v908_v39, %s2911_s14  ;;  %v1451_v30 = vshrl.u32 %v2831_v46, 16  ;;  %v440_v35 = vsel %vm342_vm1, %v430_v23, %v439_v28  ;;  %v1214_v39 = vsel %vm647_vm0, %v1209_v10, %v1213_v61  ;;  %v2834_v10 = vld [vmem:[%s2984_s4 + $0x38] sm:$0xff]   ;;  %v1736_v21 = vrot.slane %v1734_v11, 1 }
  0x8f   : > { %v1420_v47 = vrot.slane %v1418_v22, 4  ;;  %461 = vst.msk [vmem:[#allocation3 + $0x48] sm:$0xff] %vm451_vm2, %v440_v35  ;;  %v1466_v17 = vor.u32 %v1465_v62, %v1462_v60  ;;  %v2839_v46 = vld [vmem:[%s2984_s4 + $0x58] sm:$0xff]   ;;  %v1738_v53 = vshrl.u32 %v2844_v37, 16  ;;  %v1770_v23 = vshrl.u32 %v2847_v4, 16 }
  0x90   : > { %v535_v43 = vpop.permute.xlu0 %534  ;;  %v1453_v52 = vrot.slane %v1451_v30, 3 }
  0x91   : > { %564 = vst.msk [vmem:[#allocation3 + $0x8] sm:$0xff] %vm562_vm3, %v535_v43  ;;  %v1217_v43 = vor.u32 %v1215_v13, %v1213_v61  ;;  %v1421_v19 = vor.u32 %v1420_v47, %v1417_v44  ;;  %v1740_v27 = vor.u32 %v1738_v53, %v1736_v21 }
  0x92   : > { %963 = vrot.lane.b32.xlu1 %v944_v6, %s2911_s14  ;;  %1064 = vrot.lane.b32.xlu0 %v2822_v56, %s2909_s11  ;;  %v1456_v6 = vrot.slane %v1454_v32, 4 }
  0x93   : > { %v1222_v34 = vsel %vm647_vm0, %v1217_v43, %v3140_v57  ;;  %v1422_v57 = vsel %vm342_vm1, %v3169_v48, %v1421_v19  ;;  %v1431_v48 = vsel %vm342_vm1, %v1421_v19, %v3164_v42  ;;  %v1730_v42 = vshrl.u32 %v3205_v18, 16 }
  0x94   : > { %v1057_v7 = vpop.permute.xlu0 %1056  ;;  %v733_v15 = vpop.permute.xlu1 %732  ;;  %v1745_v31 = vsel %vm647_vm0, %v1740_v27, %v3200_v12 }
  0x95   : > { %763 = vst.msk [vmem:[#allocation3] sm:$0xff] %vm762_vm5, %v733_v15  ;;  %v1766_v15 = vshll.u32 %v2847_v4, 16  ;;  %v1732_v18 = vor.u32 %v1730_v42, %v3248_v59 }
  0x96   : > { %1072 = vrot.lane.b32.xlu1 %v2823_v58, %s2909_s11  ;;  %1066 = vrot.lane.b32.xlu0 %v2824_v45, %s2909_s11  ;;  %v1457_v58 = vor.u32 %v1456_v6, %v1453_v52  ;;  %v2848_v45 = vld [vmem:[%s2984_s4 + $0x68] ss:$0 sps:$4 sm:$0x11]  }
  0x97   : > { %v1768_v22 = vrot.slane %v1766_v15, 1  ;;  %v1737_v59 = vsel %vm647_vm0, %v1732_v18, %v1736_v21 }
  0x98   : > { %v735_v2 = vpop.permute.xlu1 %734  ;;  %v946_v9 = vpop.permute.xlu0 %945  ;;  %v1458_v41 = vsel %vm342_vm1, %v3175_v51, %v1457_v58  ;;  %v1467_v51 = vsel %vm342_vm1, %v1457_v58, %v1466_v17 }
  0x99   : > { %764 = vst.msk [vmem:[#allocation3 + $0x8] sm:$0xff] %vm762_vm5, %v735_v2  ;;  %v1769_v1 = vsel %vm647_vm0, %v1764_v29, %v1768_v22  ;;  %v1772_v30 = vor.u32 %v1770_v23, %v1768_v22 }
  0x9a   : > { %976 = vst.msk [vmem:[#allocation3] sm:$0xff] %vm975_vm6, %v946_v9  ;;  %1074 = vrot.lane.b32.xlu1 %v2825_v26, %s2909_s11  ;;  %1263 = vrot.lane.b32.xlu0 %v1214_v39, %s2912_s22  ;;  %v1774_v26 = vshll.u32 %v2848_v45, 16 }
  0x9b   : > { %1087 = vst.msk [vmem:[#allocation3] sm:$0xff] %vm1086_vm7, %v1057_v7 }
  0x9c   : > { %v948_v56 = vpop.permute.xlu1 %947  ;;  %v1256_v55 = vpop.permute.xlu0 %1255  ;;  %v1776_v32 = vrot.slane %v1774_v26, 1 }
  0x9d   : > { %977 = vst.msk [vmem:[#allocation3 + $0x8] sm:$0xff] %vm975_vm6, %v948_v56 }
  0x9e   : > { %1088 = vst.msk [vmem:[#allocation3 + $0x8] sm:$0xff] %vm1086_vm7, %v3319_v40  ;;  %1271 = vrot.lane.b32.xlu1 %v1246_v49, %s2912_s22  ;;  %1265 = vrot.lane.b32.xlu0 %v1222_v34, %s2912_s22  ;;  %v1777_v35 = vsel %vm647_vm0, %v1772_v30, %v1776_v32 }
  0x9f   : > { %1286 = vst.msk [vmem:[#allocation3] sm:$0xff] %vm1285_vm8, %v1256_v55 }
  0xa0   : > { %v1258_v63 = vpop.permute.xlu1 %1257  ;;  %v1469_v40 = vpop.permute.xlu0 %1468 }
  0xa1   : > { %1287 = vst.msk [vmem:[#allocation3 + $0x8] sm:$0xff] %vm1285_vm8, %v1258_v63 }
  0xa2   : > { %1273 = vrot.lane.b32.xlu1 %v1254_v36, %s2912_s22  ;;  %1499 = vst.msk [vmem:[#allocation3] sm:$0xff] %vm1498_vm9, %v1469_v40  ;;  %1476 = vrot.lane.b32.xlu0 %v1422_v57, %s2913_s23 }
  0xa4   : > { %v1471_v0 = vpop.permute.xlu1 %1470  ;;  %v1580_v3 = vpop.permute.xlu0 %1579 }
  0xa5   : > { %1500 = vst.msk [vmem:[#allocation3 + $0x8] sm:$0xff] %vm1498_vm9, %v1471_v0 }
  0xa6   : > { %1484 = vrot.lane.b32.xlu1 %v1458_v41, %s2913_s23  ;;  %1610 = vst.msk [vmem:[#allocation3] sm:$0xff] %vm1609_vm10, %v1580_v3  ;;  %1478 = vrot.lane.b32.xlu0 %v1431_v48, %s2913_s23 }
  0xa8   : > { %v1582_v7 = vpop.permute.xlu1 %1581  ;;  %v1779_v13 = vpop.permute.xlu0 %1778 }
  0xa9   : > { %1611 = vst.msk [vmem:[#allocation3 + $0x8] sm:$0xff] %vm1609_vm10, %v1582_v7 }
  0xaa   : > { %1486 = vrot.lane.b32.xlu1 %v1467_v51, %s2913_s23  ;;  %1809 = vst.msk [vmem:[#allocation3] sm:$0xff] %vm1808_vm11, %v1779_v13  ;;  %1587 = vrot.lane.b32.xlu0 %v2834_v10, %s2914_s24 }
  0xac   : > { %v537_v16 = vpop.permute.xlu1 %536  ;;  %v545_v61 = vpop.permute.xlu0 %544 }
  0xad   : > { %565 = vst.msk [vmem:[#allocation3 + $0x10] sm:$0xff] %vm562_vm3, %v537_v16  ;;  %569 = vst.msk [vmem:[#allocation3 + $0x30] sm:$0xff] %vm562_vm3, %v545_v61 }
  0xae   : > { %1595 = vrot.lane.b32.xlu1 %v2839_v46, %s2914_s24  ;;  %1589 = vrot.lane.b32.xlu0 %v2840_v20, %s2914_s24 }
  0xb0   : > { %v1781_v24 = vpop.permute.xlu1 %1780  ;;  %v539_v5 = vpop.permute.xlu0 %538 }
  0xb1   : > { %1810 = vst.msk [vmem:[#allocation3 + $0x8] sm:$0xff] %vm1808_vm11, %v1781_v24  ;;  %v1819_v28 = vld [vmem:[#allocation3] sm:$0xff] }
  0xb2   : > { %1597 = vrot.lane.b32.xlu1 %v2843_v38, %s2914_s24  ;;  %566 = vst.msk [vmem:[#allocation3 + $0x18] sm:$0xff] %vm562_vm3, %v539_v5  ;;  %2651 = vmatprep.mubr.msk.bf16.mxu0 %vm1868_vm12, %v1819_v28 }
  0xb3   : > { %1786 = vrot.lane.b32.xlu0 %v1737_v59, %s2915_s25 }
  0xb4   : > { %v547_v33 = vpop.permute.xlu1 %546  ;;  %v737_v2 = vpop.permute.xlu0 %736 }
  0xb5   : > { %570 = vst.msk [vmem:[#allocation3 + $0x38] sm:$0xff] %vm562_vm3, %v547_v33 }
  0xb6   : > { %1794 = vrot.lane.b32.xlu1 %v1769_v1, %s2915_s25  ;;  %765 = vst.msk [vmem:[#allocation3 + $0x10] sm:$0xff] %vm762_vm5, %v737_v2 }
  0xb7   : > { %1788 = vrot.lane.b32.xlu0 %v1745_v31, %s2915_s25 }
  0xb8   : > { %v745_v9 = vpop.permute.xlu1 %744  ;;  %v1820_v39 = vld [vmem:[#allocation3 + $0x8] sm:$0xff]  ;;  %v739_v43 = vpop.permute.xlu0 %738 }
  0xb9   : > { %769 = vst.msk [vmem:[#allocation3 + $0x30] sm:$0xff] %vm762_vm5, %v745_v9  ;;  %2652 = vmatmul.mubr.msk.bf16.vlgmr.msra.gmra.mrb[0].mxu0 %vm1868_vm12, %v1820_v39  ;;  %766 = vst.msk [vmem:[#allocation3 + $0x18] sm:$0xff] %vm762_vm5, %v739_v43 }
  0xba   : > { %1796 = vrot.lane.b32.xlu1 %v1777_v35, %s2915_s25 }
  0xbc   : > { %v747_v12 = vpop.permute.xlu1 %746  ;;  %v950_v44 = vpop.permute.xlu0 %949 }
  0xbd   : > { %770 = vst.msk [vmem:[#allocation3 + $0x38] sm:$0xff] %vm762_vm5, %v747_v12 }
  0xbe   : > { %978 = vst.msk [vmem:[#allocation3 + $0x10] sm:$0xff] %vm975_vm6, %v950_v44 }
  0xc0   : > { %v958_v47 = vpop.permute.xlu1 %957  ;;  %v952_v49 = vpop.permute.xlu0 %951 }
  0xc1   : > { %982 = vst.msk [vmem:[#allocation3 + $0x30] sm:$0xff] %vm975_vm6, %v958_v47  ;;  %979 = vst.msk [vmem:[#allocation3 + $0x18] sm:$0xff] %vm975_vm6, %v952_v49 }
  0xc4   : > { %v960_v25 = vpop.permute.xlu1 %959  ;;  %v1061_v50 = vpop.permute.xlu0 %1060 }
  0xc5   : > { %983 = vst.msk [vmem:[#allocation3 + $0x38] sm:$0xff] %vm975_vm6, %v960_v25 }
  0xc6   : > { %1089 = vst.msk [vmem:[#allocation3 + $0x10] sm:$0xff] %vm1086_vm7, %v1061_v50 }
  0xc8   : > { %v1069_v52 = vpop.permute.xlu1 %1068  ;;  %v1063_v6 = vpop.permute.xlu0 %1062 }
  0xc9   : > { %1093 = vst.msk [vmem:[#allocation3 + $0x30] sm:$0xff] %vm1086_vm7, %v1069_v52  ;;  %1090 = vst.msk [vmem:[#allocation3 + $0x18] sm:$0xff] %vm1086_vm7, %v1063_v6 }
  0xcc   : > { %v1071_v54 = vpop.permute.xlu1 %1070  ;;  %v1260_v8 = vpop.permute.xlu0 %1259 }
  0xcd   : > { %1094 = vst.msk [vmem:[#allocation3 + $0x38] sm:$0xff] %vm1086_vm7, %v1071_v54 }
  0xce   : > { %1288 = vst.msk [vmem:[#allocation3 + $0x10] sm:$0xff] %vm1285_vm8, %v1260_v8 }
  0xd0   : > { %v1268_v56 = vpop.permute.xlu1 %1267  ;;  %v1262_v34 = vpop.permute.xlu0 %1261 }
  0xd1   : > { %1292 = vst.msk [vmem:[#allocation3 + $0x30] sm:$0xff] %vm1285_vm8, %v1268_v56  ;;  %1289 = vst.msk [vmem:[#allocation3 + $0x18] sm:$0xff] %vm1285_vm8, %v1262_v34 }
  0xd4   : > { %v1270_v19 = vpop.permute.xlu1 %1269  ;;  %v1473_v55 = vpop.permute.xlu0 %1472 }
  0xd5   : > { %1293 = vst.msk [vmem:[#allocation3 + $0x38] sm:$0xff] %vm1285_vm8, %v1270_v19 }
  0xd6   : > { %1501 = vst.msk [vmem:[#allocation3 + $0x10] sm:$0xff] %vm1498_vm9, %v1473_v55 }
  0xd8   : > { %v1481_v36 = vpop.permute.xlu1 %1480  ;;  %v1475_v58 = vpop.permute.xlu0 %1474 }
  0xd9   : > { %1505 = vst.msk [vmem:[#allocation3 + $0x30] sm:$0xff] %vm1498_vm9, %v1481_v36  ;;  %1502 = vst.msk [vmem:[#allocation3 + $0x18] sm:$0xff] %vm1498_vm9, %v1475_v58 }
  0xdc   : > { %v1483_v60 = vpop.permute.xlu1 %1482  ;;  %v1584_v62 = vpop.permute.xlu0 %1583 }
  0xdd   : > { %1506 = vst.msk [vmem:[#allocation3 + $0x38] sm:$0xff] %vm1498_vm9, %v1483_v60 }
  0xde   : > { %1612 = vst.msk [vmem:[#allocation3 + $0x10] sm:$0xff] %vm1609_vm10, %v1584_v62 }
  0xe0   : > { %v1592_v63 = vpop.permute.xlu1 %1591  ;;  %v1586_v57 = vpop.permute.xlu0 %1585 }
  0xe1   : > { %1616 = vst.msk [vmem:[#allocation3 + $0x30] sm:$0xff] %vm1609_vm10, %v1592_v63  ;;  %1613 = vst.msk [vmem:[#allocation3 + $0x18] sm:$0xff] %vm1609_vm10, %v1586_v57 }
  0xe4   : > { %v1594_v40 = vpop.permute.xlu1 %1593  ;;  %v1783_v41 = vpop.permute.xlu0 %1782 }
  0xe5   : > { %1617 = vst.msk [vmem:[#allocation3 + $0x38] sm:$0xff] %vm1609_vm10, %v1594_v40 }
  0xe6   : > { %1811 = vst.msk [vmem:[#allocation3 + $0x10] sm:$0xff] %vm1808_vm11, %v1783_v41  ;;  %v2521_v41 = vld [vmem:[%s3612_s2] ss:$0 sm:$0xff] (!%p2520_p9) }
  0xe8   : > { %v1791_v17 = vpop.permute.xlu1 %1790  ;;  %v541_v0 = vpop.permute.xlu0 %540 }
  0xe9   : > { %1815 = vst.msk [vmem:[#allocation3 + $0x30] sm:$0xff] %vm1808_vm11, %v1791_v17 }
  0xea   : > { %567 = vst.msk [vmem:[#allocation3 + $0x20] sm:$0xff] %vm562_vm3, %v541_v0 }
  0xec   : > { %v549_v48 = vpop.permute.xlu1 %548  ;;  %v1785_v37 = vpop.permute.xlu0 %1784 }
  0xed   : > { %571 = vst.msk [vmem:[#allocation3 + $0x40] sm:$0xff] %vm562_vm3, %v549_v48  ;;  %v1821_v3 = vld [vmem:[#allocation3 + $0x10] sm:$0xff] }
  0xee   : > { %1812 = vst.msk [vmem:[#allocation3 + $0x18] sm:$0xff] %vm1808_vm11, %v1785_v37  ;;  %2655 = vmatprep.mubr.msk.bf16.mxu0 %vm1868_vm12, %v1821_v3 }
  0xf0   : > { %v1793_v51 = vpop.permute.xlu1 %1792  ;;  %v1825_v4 = vld [vmem:[#allocation3 + $0x30] sm:$0xff]  ;;  %v543_v7 = vpop.permute.xlu0 %542 }
  0xf1   : > { %1816 = vst.msk [vmem:[#allocation3 + $0x38] sm:$0xff] %vm1808_vm11, %v1793_v51  ;;  %2663 = vmatprep.mubr.msk.bf16.mxu1 %vm1868_vm12, %v1825_v4 }
  0xf2   : > { %568 = vst.msk [vmem:[#allocation3 + $0x28] sm:$0xff] %vm562_vm3, %v543_v7 }
  0xf4   : > { %v551_v10 = vpop.permute.xlu1 %550  ;;  %v741_v42 = vpop.permute.xlu0 %740 }
  0xf5   : > { %572 = vst.msk [vmem:[#allocation3 + $0x48] sm:$0xff] %vm562_vm3, %v551_v10  ;;  %v1822_v11 = vld [vmem:[#allocation3 + $0x18] sm:$0xff] }
  0xf6   : > { %767 = vst.msk [vmem:[#allocation3 + $0x20] sm:$0xff] %vm762_vm5, %v741_v42  ;;  %2656 = vmatmul.mubr.msk.bf16.gmra.mrb[4].mxu0 %vm1868_vm12, %v1822_v11 }
  0xf8   : > { %v749_v13 = vpop.permute.xlu1 %748  ;;  %v1826_v46 = vld [vmem:[#allocation3 + $0x38] sm:$0xff]  ;;  %v743_v14 = vpop.permute.xlu0 %742 }
  0xf9   : > { %771 = vst.msk [vmem:[#allocation3 + $0x40] sm:$0xff] %vm762_vm5, %v749_v13  ;;  %2664 = vmatmul.mubr.msk.bf16.vlgmr.msra.gmra.mrb[0].mxu1 %vm1868_vm12, %v1826_v46  ;;  %768 = vst.msk [vmem:[#allocation3 + $0x28] sm:$0xff] %vm762_vm5, %v743_v14 }
  0xfc   : > { %v751_v15 = vpop.permute.xlu1 %750  ;;  %v954_v45 = vpop.permute.xlu0 %953 }
  0xfd   : > { %772 = vst.msk [vmem:[#allocation3 + $0x48] sm:$0xff] %vm762_vm5, %v751_v15 }
  0xfe   : > { %980 = vst.msk [vmem:[#allocation3 + $0x20] sm:$0xff] %vm975_vm6, %v954_v45 }
 0x100   : > { %v962_v16 = vpop.permute.xlu1 %961  ;;  %v956_v20 = vpop.permute.xlu0 %955 }
 0x101   : > { %984 = vst.msk [vmem:[#allocation3 + $0x40] sm:$0xff] %vm975_vm6, %v962_v16  ;;  %981 = vst.msk [vmem:[#allocation3 + $0x28] sm:$0xff] %vm975_vm6, %v956_v20 }
 0x104   : > { %v964_v18 = vpop.permute.xlu1 %963  ;;  %v1065_v21 = vpop.permute.xlu0 %1064 }
 0x105   : > { %985 = vst.msk [vmem:[#allocation3 + $0x48] sm:$0xff] %vm975_vm6, %v964_v18 }
 0x106   : > { %1091 = vst.msk [vmem:[#allocation3 + $0x20] sm:$0xff] %vm1086_vm7, %v1065_v21 }
 0x108   : > { %v1073_v53 = vpop.permute.xlu1 %1072  ;;  %v1067_v61 = vpop.permute.xlu0 %1066 }
 0x109   : > { %1095 = vst.msk [vmem:[#allocation3 + $0x40] sm:$0xff] %vm1086_vm7, %v1073_v53  ;;  %1092 = vst.msk [vmem:[#allocation3 + $0x28] sm:$0xff] %vm1086_vm7, %v1067_v61 }
 0x10c   : > { %v1075_v38 = vpop.permute.xlu1 %1074  ;;  %v1264_v29 = vpop.permute.xlu0 %1263 }
 0x10d   : > { %1096 = vst.msk [vmem:[#allocation3 + $0x48] sm:$0xff] %vm1086_vm7, %v1075_v38 }
 0x10e   : > { %1290 = vst.msk [vmem:[#allocation3 + $0x20] sm:$0xff] %vm1285_vm8, %v1264_v29 }
 0x110   : > { %v1272_v22 = vpop.permute.xlu1 %1271  ;;  %v1266_v23 = vpop.permute.xlu0 %1265 }
 0x111   : > { %1294 = vst.msk [vmem:[#allocation3 + $0x40] sm:$0xff] %vm1285_vm8, %v1272_v22  ;;  %1291 = vst.msk [vmem:[#allocation3 + $0x28] sm:$0xff] %vm1285_vm8, %v1266_v23 }
 0x114   : > { %v1274_v26 = vpop.permute.xlu1 %1273  ;;  %v1477_v24 = vpop.permute.xlu0 %1476 }
 0x115   : > { %1295 = vst.msk [vmem:[#allocation3 + $0x48] sm:$0xff] %vm1285_vm8, %v1274_v26 }
 0x116   : > { %1503 = vst.msk [vmem:[#allocation3 + $0x20] sm:$0xff] %vm1498_vm9, %v1477_v24 }
 0x118   : > { %v1485_v59 = vpop.permute.xlu1 %1484  ;;  %v1479_v27 = vpop.permute.xlu0 %1478 }
 0x119   : > { %1507 = vst.msk [vmem:[#allocation3 + $0x40] sm:$0xff] %vm1498_vm9, %v1485_v59  ;;  %1504 = vst.msk [vmem:[#allocation3 + $0x28] sm:$0xff] %vm1498_vm9, %v1479_v27 }
 0x11c   : > { %v1487_v5 = vpop.permute.xlu1 %1486  ;;  %v1588_v28 = vpop.permute.xlu0 %1587 }
 0x11d   : > { %1508 = vst.msk [vmem:[#allocation3 + $0x48] sm:$0xff] %vm1498_vm9, %v1487_v5 }
 0x11e   : > { %1614 = vst.msk [vmem:[#allocation3 + $0x20] sm:$0xff] %vm1609_vm10, %v1588_v28 }
 0x120   : > { %v1596_v1 = vpop.permute.xlu1 %1595  ;;  %v1590_v30 = vpop.permute.xlu0 %1589 }
 0x121   : > { %1618 = vst.msk [vmem:[#allocation3 + $0x40] sm:$0xff] %vm1609_vm10, %v1596_v1  ;;  %1615 = vst.msk [vmem:[#allocation3 + $0x28] sm:$0xff] %vm1609_vm10, %v1590_v30 }
 0x124   : > { %v1598_v32 = vpop.permute.xlu1 %1597 }
 0x125   : > { %1619 = vst.msk [vmem:[#allocation3 + $0x48] sm:$0xff] %vm1609_vm10, %v1598_v32  ;;  %v1787_v33 = vpop.permute.xlu0 %1786 }
 0x126   : > { %1813 = vst.msk [vmem:[#allocation3 + $0x20] sm:$0xff] %vm1808_vm11, %v1787_v33 }
 0x128   : > { %v1795_v31 = vpop.permute.xlu1 %1794 }
 0x129   : > { %1817 = vst.msk [vmem:[#allocation3 + $0x40] sm:$0xff] %vm1808_vm11, %v1795_v31  ;;  %v1789_v2 = vpop.permute.xlu0 %1788 }
 0x12a   : > { %1814 = vst.msk [vmem:[#allocation3 + $0x28] sm:$0xff] %vm1808_vm11, %v1789_v2 }
 0x12c   : > { %v1797_v35 = vpop.permute.xlu1 %1796 }
 0x12d   : > { %1818 = vst.msk [vmem:[#allocation3 + $0x48] sm:$0xff] %vm1808_vm11, %v1797_v35  ;;  %v1823_v9 = vld [vmem:[#allocation3 + $0x20] sm:$0xff] }
 0x12e   : > { %2659 = vmatprep.mubr.msk.bf16.mxu0 %vm1868_vm12, %v1823_v9 }
 0x130   : > { %v1827_v39 = vld [vmem:[#allocation3 + $0x40] sm:$0xff] }
 0x131   : > { %2667 = vmatprep.mubr.msk.bf16.mxu1 %vm1868_vm12, %v1827_v39  ;;  %v1824_v43 = vld [vmem:[#allocation3 + $0x28] sm:$0xff] }
 0x132   : > { %2660 = vmatmul.mubr.msk.bf16.gmra.mrb[8].mxu0 %vm1868_vm12, %v1824_v43 }
 0x134   : > { %v1828_v12 = vld [vmem:[#allocation3 + $0x48] sm:$0xff] }
 0x135   : > { %2668 = vmatmul.mubr.msk.bf16.gmra.mrb[4].mxu1 %vm1868_vm12, %v1828_v12 }
 0x18c   : > { %v3493_v44 = vpop.f32.mrb[0].mxu0 }
 0x18d   : > { %v3495_v47 = vpop.f32.mrb[1].mxu0  ;;  %v2029_v48 = vadd.f32 (!%p2520_p9), %v3493_v44, %v2521_v41 }
 0x18e   : > { %v3497_v49 = vpop.f32.mrb[2].mxu0  ;;  %v2027_v17 = vadd.f32 (!%p2520_p9), %v2521_v41, %v3495_v47 }
 0x18f   : > { %v3499_v25 = vpop.f32.mrb[3].mxu0  ;;  %v2030_v37 = vadd.f32 (!%p2520_p9), %v3497_v49, %v2521_v41  ;;  %2049 = vst [vmem:[#allocation2 + $0x10] sm:$0xff] (!%p2520_p9), %v2029_v48 }
 0x190   : > { %v2028_v0 = vadd.f32 (!%p2520_p9), %v2521_v41, %v3499_v25  ;;  %2047 = vst [vmem:[#allocation2] sm:$0xff] (!%p2520_p9), %v2027_v17 }
 0x191   : > { %2050 = vst [vmem:[#allocation2 + $0x18] sm:$0xff] (!%p2520_p9), %v2030_v37 }
 0x192   : > { %2048 = vst [vmem:[#allocation2 + $0x8] sm:$0xff] (!%p2520_p9), %v2028_v0 }
 0x1c9   : > { %v3501_v50 = vpop.f32.mrb[4].mxu0 }
 0x1ca   : > { %v3503_v52 = vpop.f32.mrb[5].mxu0  ;;  %v2033_v4 = vadd.f32 (!%p2520_p9), %v3501_v50, %v2521_v41 }
 0x1cb   : > { %v3505_v6 = vpop.f32.mrb[6].mxu0  ;;  %v2031_v3 = vadd.f32 (!%p2520_p9), %v2521_v41, %v3503_v52 }
 0x1cc   : > { %v3507_v54 = vpop.f32.mrb[0].mxu1  ;;  %v3509_v8 = vpop.f32.mrb[7].mxu0  ;;  %v2034_v7 = vadd.f32 (!%p2520_p9), %v3505_v6, %v2521_v41  ;;  %2053 = vst [vmem:[#allocation2 + $0x30] sm:$0xff] (!%p2520_p9), %v2033_v4 }
 0x1cd   : > { %v3511_v56 = vpop.f32.mrb[1].mxu1  ;;  %v2032_v51 = vadd.f32 (!%p2520_p9), %v2521_v41, %v3509_v8  ;;  %2051 = vst [vmem:[#allocation2 + $0x20] sm:$0xff] (!%p2520_p9), %v2031_v3  ;;  %v2041_v15 = vadd.f32 (!%p2520_p9), %v3507_v54, %v2521_v41 }
 0x1ce   : > { %v3513_v34 = vpop.f32.mrb[2].mxu1  ;;  %2054 = vst [vmem:[#allocation2 + $0x38] sm:$0xff] (!%p2520_p9), %v2034_v7  ;;  %v2039_v46 = vadd.f32 (!%p2520_p9), %v2521_v41, %v3511_v56 }
 0x1cf   : > { %v3515_v19 = vpop.f32.mrb[3].mxu1  ;;  %2052 = vst [vmem:[#allocation2 + $0x28] sm:$0xff] (!%p2520_p9), %v2032_v51  ;;  %v2042_v45 = vadd.f32 (!%p2520_p9), %v3513_v34, %v2521_v41  ;;  %2061 = vst [vmem:[#allocation2 + $0x70] sm:$0xff] (!%p2520_p9), %v2041_v15 }
 0x1d0   : > { %v2040_v14 = vadd.f32 (!%p2520_p9), %v2521_v41, %v3515_v19  ;;  %2059 = vst [vmem:[#allocation2 + $0x60] sm:$0xff] (!%p2520_p9), %v2039_v46 }
 0x1d1   : > { %2062 = vst [vmem:[#allocation2 + $0x78] sm:$0xff] (!%p2520_p9), %v2042_v45 }
 0x1d2   : > { %2060 = vst [vmem:[#allocation2 + $0x68] sm:$0xff] (!%p2520_p9), %v2040_v14 }
 0x205   : > { %v3517_v55 = vpop.f32.mrb[8].mxu0  ;;  %2019 = sbr.rel (%p2520_p9) target bundleno = 527 (0x20f), region = 36 }
 0x206   : > { %v3519_v36 = vpop.f32.mrb[9].mxu0  ;;  %v2037_v11 = vadd.f32 (!%p2520_p9), %v3517_v55, %v2521_v41 }
 0x207   : > { %v3521_v58 = vpop.f32.mrb[10].mxu0  ;;  %v2035_v10 = vadd.f32 (!%p2520_p9), %v2521_v41, %v3519_v36 }
 0x208   : > { %v3523_v60 = vpop.f32.mrb[4].mxu1  ;;  %v3525_v62 = vpop.f32.mrb[11].mxu0  ;;  %v2038_v13 = vadd.f32 (!%p2520_p9), %v3521_v58, %v2521_v41  ;;  %2057 = vst [vmem:[#allocation2 + $0x50] sm:$0xff] (!%p2520_p9), %v2037_v11 }
 0x209   : > { %v3527_v63 = vpop.f32.mrb[5].mxu1  ;;  %v2036_v42 = vadd.f32 (!%p2520_p9), %v2521_v41, %v3525_v62  ;;  %2055 = vst [vmem:[#allocation2 + $0x40] sm:$0xff] (!%p2520_p9), %v2035_v10  ;;  %v2045_v18 = vadd.f32 (!%p2520_p9), %v3523_v60, %v2521_v41 }
 0x20a   : > { %v3529_v57 = vpop.f32.mrb[6].mxu1  ;;  %2058 = vst [vmem:[#allocation2 + $0x58] sm:$0xff] (!%p2520_p9), %v2038_v13  ;;  %v2043_v16 = vadd.f32 (!%p2520_p9), %v2521_v41, %v3527_v63 }
 0x20b   : > { %v3531_v40 = vpop.f32.mrb[7].mxu1  ;;  %2056 = vst [vmem:[#allocation2 + $0x48] sm:$0xff] (!%p2520_p9), %v2036_v42  ;;  %v2046_v21 = vadd.f32 (!%p2520_p9), %v3529_v57, %v2521_v41  ;;  %2065 = vst [vmem:[#allocation2 + $0x90] sm:$0xff] (!%p2520_p9), %v2045_v18 }
 0x20c   : > { %v2044_v20 = vadd.f32 %v2521_v41, %v3531_v40  ;;  %2063 = vst [vmem:[#allocation2 + $0x80] sm:$0xff] %v2043_v16 }
 0x20d   : > { %2066 = vst [vmem:[#allocation2 + $0x98] sm:$0xff] %v2046_v21 }
 0x20e   : > { %2064 = vst [vmem:[#allocation2 + $0x88] sm:$0xff] %v2044_v20 }
 0x20f PF: > { %p2522_p10 = scmp.le.s32.totalorder %s2882_s12, 0 }
 0x210   : > { %v2071_v53 = vld [vmem:[#allocation2] sm:$0xff] (!%p2522_p10)  ;;  %v2072_v61 = vld [vmem:[#allocation2 + $0x8] sm:$0xff] (!%p2522_p10)  ;;  %v2073_v38 = vld [vmem:[#allocation2 + $0x10] sm:$0xff] (!%p2522_p10) }
 0x211   : > { %2070 = sbr.rel (%p2522_p10) target bundleno = 541 (0x21d), region = 40  ;;  %v2091_v29 = vadd.f32 (!%p2522_p10), %v2071_v53, %v3495_v47  ;;  %v2092_v22 = vadd.f32 (!%p2522_p10), %v2072_v61, %v3499_v25  ;;  %v2093_v23 = vadd.f32 (!%p2522_p10), %v3493_v44, %v2073_v38  ;;  %v2074_v26 = vld [vmem:[#allocation2 + $0x18] sm:$0xff] (!%p2522_p10)  ;;  %v2075_v24 = vld [vmem:[#allocation2 + $0x20] sm:$0xff] (!%p2522_p10)  ;;  %v2076_v59 = vld [vmem:[#allocation2 + $0x28] sm:$0xff] (!%p2522_p10) }
 0x212   : > { %v2094_v27 = vadd.f32 (!%p2522_p10), %v3497_v49, %v2074_v26  ;;  %v2095_v5 = vadd.f32 (!%p2522_p10), %v2075_v24, %v3503_v52  ;;  %v2096_v28 = vadd.f32 (!%p2522_p10), %v2076_v59, %v3509_v8  ;;  %v2077_v1 = vld [vmem:[#allocation2 + $0x30] sm:$0xff] (!%p2522_p10)  ;;  %v2078_v30 = vld [vmem:[#allocation2 + $0x38] sm:$0xff] (!%p2522_p10)  ;;  %v2083_v47 = vld [vmem:[#allocation2 + $0x60] sm:$0xff] (!%p2522_p10) }
 0x213   : > { %v2079_v32 = vld [vmem:[#allocation2 + $0x40] sm:$0xff] (!%p2522_p10)  ;;  %2111 = vst [vmem:[#allocation2] sm:$0xff] (!%p2522_p10), %v2091_v29  ;;  %2112 = vst [vmem:[#allocation2 + $0x8] sm:$0xff] (!%p2522_p10), %v2092_v22  ;;  %v2097_v33 = vadd.f32 (!%p2522_p10), %v3501_v50, %v2077_v1  ;;  %v2098_v31 = vadd.f32 (!%p2522_p10), %v3505_v6, %v2078_v30  ;;  %v2081_v9 = vld [vmem:[#allocation2 + $0x50] sm:$0xff] (!%p2522_p10)  ;;  %v2103_v50 = vadd.f32 (!%p2522_p10), %v2083_v47, %v3511_v56 }
 0x214   : > { %2113 = vst [vmem:[#allocation2 + $0x10] sm:$0xff] (!%p2522_p10), %v2093_v23  ;;  %v2099_v2 = vadd.f32 (!%p2522_p10), %v2079_v32, %v3519_v36  ;;  %v2082_v39 = vld [vmem:[#allocation2 + $0x58] sm:$0xff] (!%p2522_p10)  ;;  %2114 = vst [vmem:[#allocation2 + $0x18] sm:$0xff] (!%p2522_p10), %v2094_v27  ;;  %v2101_v12 = vadd.f32 (!%p2522_p10), %v3517_v55, %v2081_v9  ;;  %v2084_v49 = vld [vmem:[#allocation2 + $0x68] sm:$0xff] (!%p2522_p10) }
 0x215   : > { %v2080_v35 = vld [vmem:[#allocation2 + $0x48] sm:$0xff] (!%p2522_p10)  ;;  %2115 = vst [vmem:[#allocation2 + $0x20] sm:$0xff] (!%p2522_p10), %v2095_v5  ;;  %2116 = vst [vmem:[#allocation2 + $0x28] sm:$0xff] (!%p2522_p10), %v2096_v28  ;;  %v2102_v44 = vadd.f32 (!%p2522_p10), %v3521_v58, %v2082_v39  ;;  %v2085_v25 = vld [vmem:[#allocation2 + $0x70] sm:$0xff] (!%p2522_p10)  ;;  %v2104_v52 = vadd.f32 (!%p2522_p10), %v2084_v49, %v3515_v19 }
 0x216   : > { %v2100_v43 = vadd.f32 (!%p2522_p10), %v2080_v35, %v3525_v62  ;;  %2117 = vst [vmem:[#allocation2 + $0x30] sm:$0xff] (!%p2522_p10), %v2097_v33  ;;  %2118 = vst [vmem:[#allocation2 + $0x38] sm:$0xff] (!%p2522_p10), %v2098_v31  ;;  %v2105_v6 = vadd.f32 (!%p2522_p10), %v3507_v54, %v2085_v25  ;;  %v2086_v8 = vld [vmem:[#allocation2 + $0x78] sm:$0xff] (!%p2522_p10)  ;;  %v2087_v36 = vld [vmem:[#allocation2 + $0x80] sm:$0xff] (!%p2522_p10) }
 0x217   : > { %2119 = vst [vmem:[#allocation2 + $0x40] sm:$0xff] (!%p2522_p10), %v2099_v2  ;;  %v2088_v41 = vld [vmem:[#allocation2 + $0x88] sm:$0xff] (!%p2522_p10)  ;;  %2121 = vst [vmem:[#allocation2 + $0x50] sm:$0xff] (!%p2522_p10), %v2101_v12  ;;  %v2106_v55 = vadd.f32 (!%p2522_p10), %v3513_v34, %v2086_v8  ;;  %v2107_v58 = vadd.f32 (!%p2522_p10), %v2087_v36, %v3527_v63  ;;  %v2089_v17 = vld [vmem:[#allocation2 + $0x90] sm:$0xff] (!%p2522_p10) }
 0x218   : > { %2120 = vst [vmem:[#allocation2 + $0x48] sm:$0xff] %v2100_v43  ;;  %2122 = vst [vmem:[#allocation2 + $0x58] sm:$0xff] %v2102_v44  ;;  %v2108_v62 = vadd.f32 %v2088_v41, %v3531_v40  ;;  %v2090_v0 = vld [vmem:[#allocation2 + $0x98] sm:$0xff]  ;;  %v2109_v56 = vadd.f32 %v3523_v60, %v2089_v17 }
 0x219   : > { %2123 = vst [vmem:[#allocation2 + $0x60] sm:$0xff] %v2103_v50  ;;  %2124 = vst [vmem:[#allocation2 + $0x68] sm:$0xff] %v2104_v52  ;;  %v2110_v54 = vadd.f32 %v3529_v57, %v2090_v0 }
 0x21a   : > { %2125 = vst [vmem:[#allocation2 + $0x70] sm:$0xff] %v2105_v6  ;;  %2126 = vst [vmem:[#allocation2 + $0x78] sm:$0xff] %v2106_v55 }
 0x21b   : > { %2127 = vst [vmem:[#allocation2 + $0x80] sm:$0xff] %v2107_v58  ;;  %2128 = vst [vmem:[#allocation2 + $0x88] sm:$0xff] %v2108_v62 }
 0x21c   : > { %2129 = vst [vmem:[#allocation2 + $0x90] sm:$0xff] %v2109_v56  ;;  %2130 = vst [vmem:[#allocation2 + $0x98] sm:$0xff] %v2110_v54 }
 0x21d PF: > { %p2523_p11 = scmp.ne.s32.totalorder %s2882_s12, 2 }
 0x21f   : > { %2134 = sbr.rel (%p2523_p11) target bundleno = 553 (0x229), region = 44  ;;  %v2135_v34 = vld [vmem:[#allocation2] sm:$0xff] (!%p2523_p11)  ;;  %v2136_v19 = vld [vmem:[#allocation2 + $0x8] sm:$0xff] (!%p2523_p11) }
 0x220   : > { %v2137_v63 = vld [vmem:[#allocation2 + $0x10] sm:$0xff] (!%p2523_p11)  ;;  %v2570_v40 = vpack.c.bf16 (!%p2523_p11), %v2136_v19, %v2135_v34  ;;  %v2138_v48 = vld [vmem:[#allocation2 + $0x18] sm:$0xff] (!%p2523_p11)  ;;  %v2147_v15 = vld [vmem:[#allocation2 + $0x60] sm:$0xff] (!%p2523_p11) }
 0x221   : > { %v2139_v60 = vld [vmem:[#allocation2 + $0x20] sm:$0xff] (!%p2523_p11)  ;;  %v2140_v37 = vld [vmem:[#allocation2 + $0x28] sm:$0xff] (!%p2523_p11)  ;;  %v2575_v57 = vpack.c.bf16 (!%p2523_p11), %v2138_v48, %v2137_v63  ;;  %v2149_v16 = vld [vmem:[#allocation2 + $0x70] sm:$0xff] (!%p2523_p11) }
 0x222   : > { %v2580_v3 = vpack.c.bf16 (!%p2523_p11), %v2140_v37, %v2139_v60  ;;  %v2141_v51 = vld [vmem:[#allocation2 + $0x30] sm:$0xff] (!%p2523_p11)  ;;  %v2142_v4 = vld [vmem:[#allocation2 + $0x38] sm:$0xff] (!%p2523_p11)  ;;  %2571 = vst [vmem:[%s2991_s9] sm:$0xff] (!%p2523_p11), %v2570_v40   ;;  %v2148_v45 = vld [vmem:[#allocation2 + $0x68] sm:$0xff] (!%p2523_p11) }
 0x223   : > { %v2143_v7 = vld [vmem:[#allocation2 + $0x40] sm:$0xff] (!%p2523_p11)  ;;  %v2585_v10 = vpack.c.bf16 (!%p2523_p11), %v2142_v4, %v2141_v51  ;;  %v2145_v11 = vld [vmem:[#allocation2 + $0x50] sm:$0xff] (!%p2523_p11)  ;;  %2617 = vst [vmem:[%s2991_s9 + $0x8] sm:$0xff] (!%p2523_p11), %v2575_v57   ;;  %v2600_v20 = vpack.c.bf16 (!%p2523_p11), %v2148_v45, %v2147_v15  ;;  %v2150_v18 = vld [vmem:[#allocation2 + $0x78] sm:$0xff] (!%p2523_p11) }
 0x224   : > { %v2144_v42 = vld [vmem:[#allocation2 + $0x48] sm:$0xff] (!%p2523_p11)  ;;  %v2146_v13 = vld [vmem:[#allocation2 + $0x58] sm:$0xff] (!%p2523_p11)  ;;  %2618 = vst [vmem:[%s2991_s9 + $0x10] sm:$0xff] (!%p2523_p11), %v2580_v3   ;;  %v2151_v21 = vld [vmem:[#allocation2 + $0x80] sm:$0xff] (!%p2523_p11)  ;;  %v2605_v61 = vpack.c.bf16 (!%p2523_p11), %v2150_v18, %v2149_v16 }
 0x225   : > { %v2590_v46 = vpack.c.bf16 (!%p2523_p11), %v2144_v42, %v2143_v7  ;;  %v2595_v14 = vpack.c.bf16 (!%p2523_p11), %v2146_v13, %v2145_v11  ;;  %2619 = vst [vmem:[%s2991_s9 + $0x18] sm:$0xff] (!%p2523_p11), %v2585_v10   ;;  %v2152_v53 = vld [vmem:[#allocation2 + $0x88] sm:$0xff] (!%p2523_p11)  ;;  %v2153_v29 = vld [vmem:[#allocation2 + $0x90] sm:$0xff] (!%p2523_p11)  ;;  %v2154_v22 = vld [vmem:[#allocation2 + $0x98] sm:$0xff] (!%p2523_p11) }
 0x226   : > { %v2610_v38 = vpack.c.bf16 %v2152_v53, %v2151_v21  ;;  %2622 = vst [vmem:[%s2991_s9 + $0x30] sm:$0xff] %v2600_v20   ;;  %v2615_v23 = vpack.c.bf16 %v2154_v22, %v2153_v29  ;;  %2623 = vst [vmem:[%s2991_s9 + $0x38] sm:$0xff] %v2605_v61  }
 0x227   : > { %2620 = vst [vmem:[%s2991_s9 + $0x20] sm:$0xff] %v2590_v46   ;;  %2621 = vst [vmem:[%s2991_s9 + $0x28] sm:$0xff] %v2595_v14  }
 0x228   : > { %2624 = vst [vmem:[%s2991_s9 + $0x40] sm:$0xff] %v2610_v38   ;;  %2625 = vst [vmem:[%s2991_s9 + $0x48] sm:$0xff] %v2615_v23  }
 0x229 PF: > { %s13_s18 = sadd.s32 1, %s2906_s18   ;;  %s3614_s12 = smov %s2894_s15 }
 0x22a   : > { %p10_p12 = scmp.ge.s32.totalorder %s13_s18, 26   ;;  %s3615_s13 = smov %s2898_s16 }
 0x22b   : > { %s3616_s14 = smov %s2902_s17  ;;  %s3617_s15 = smov %s3621_s19 }
 0x22c   : > { %s3618_s16 = smov %s3625_s20  ;;  %s3619_s17 = smov %s3629_s21 }
 0x22d   :  { %12 = sbr.rel (!%p10_p12) target bundleno = 4 (0x4), region = 81 }

</bundles_post_ra>
